<compile_context>
chip_gen: v5e
topology: v5e:2x2
jax: 0.10.0
libtpu: 0.0.40
codegen_flags: <defaults>
</compile_context>

<pallas_src>
import functools
import math

import jax
import jax.numpy as jnp
from jax.experimental import pallas as pl
from jax.experimental.pallas import tpu as pltpu


# ----------------------------------------------------------------------------
# Pallas kernel: the full transformer stack (all layers, all batch elements).
# ----------------------------------------------------------------------------
def _transformer_kernel(x_ref, wqkv_ref, wo_ref,
                        ln1_g_ref, ln1_b_ref,
                        w1_ref, b1_ref, w2_ref, b2_ref,
                        ln2_g_ref, ln2_b_ref,
                        o_ref, *, depth, heads, eps):
    B, S, D = x_ref.shape
    BS = B * S
    hd = D // heads

    def layernorm(v, g, b):
        mu = jnp.mean(v, axis=-1, keepdims=True)
        var = jnp.mean((v - mu) ** 2, axis=-1, keepdims=True)
        return (v - mu) * jax.lax.rsqrt(var + eps) * g + b

    # Activations live in VMEM/vregs for the whole network.
    x = x_ref[...].reshape(BS, D)                               # (B*S, D) f32

    for l in range(depth):                                      # static unroll
        # ---- PreNormMulti: LayerNorm -> MultiheadAttention (bias=False) ----
        xn = layernorm(x, ln1_g_ref[l], ln1_b_ref[l])
        qkv = jnp.dot(xn.astype(jnp.bfloat16), wqkv_ref[l],
                      preferred_element_type=jnp.float32)       # (B*S, 3D) f32
        # 1/sqrt(hd) query scale already folded into the Wq columns.
        qkv_b = qkv.astype(jnp.bfloat16)

        # Assemble (heads*B, S, hd) batches: per-head lane slice of the fused
        # qkv slab, reshaped to (B, S, hd), stacked along the leading axis.
        # Batch index is h*B + b.
        def head_batch(base):
            return jnp.concatenate(
                [qkv_b[:, base + h * hd: base + (h + 1) * hd].reshape(B, S, hd)
                 for h in range(heads)], axis=0)
        q_bh = head_batch(0)                                    # (H*B, S, hd)
        k_bh = head_batch(D)
        v_bh = head_batch(2 * D)

        # ONE batched QK^T, ONE softmax, ONE batched PV for all heads.
        s = jnp.einsum("bqd,bkd->bqk", q_bh, k_bh,
                       preferred_element_type=jnp.float32)      # (H*B, S, S)
        s = s - jnp.max(s, axis=-1, keepdims=True)
        p = jnp.exp(s)
        p = p * pl.reciprocal(jnp.sum(p, axis=-1, keepdims=True), approx=True)
        oh = jnp.einsum("bqk,bkd->bqd", p.astype(jnp.bfloat16), v_bh,
                        preferred_element_type=jnp.float32)     # (H*B, S, hd)

        # Reassemble heads onto their disjoint hd-wide lane ranges -> (BS, D),
        # then ONE (BS, D) @ (D, D) output projection.
        attn = jnp.concatenate(
            [oh[h * B:(h + 1) * B] for h in range(heads)],
            axis=-1).reshape(BS, D)                             # (B*S, D) f32
        attn = jnp.dot(attn.astype(jnp.bfloat16), wo_ref[l],
                       preferred_element_type=jnp.float32)
        x = x + attn                                            # residual 1

        # ---- PreNorm: LayerNorm -> FeedForward (Linear, GELU, Linear) ------
        xn2 = layernorm(x, ln2_g_ref[l], ln2_b_ref[l])
        h1 = jnp.dot(xn2.astype(jnp.bfloat16), w1_ref[l],
                     preferred_element_type=jnp.float32) + b1_ref[l]
        # tanh-approx GELU: EUP path instead of VPU erf polynomial
        # (deliberate, documented accuracy/perf trade vs exact nn.GELU()).
        h1 = jax.nn.gelu(h1, approximate=True)
        h2 = jnp.dot(h1.astype(jnp.bfloat16), w2_ref[l],
                     preferred_element_type=jnp.float32) + b2_ref[l]
        x = x + h2                                              # residual 2

    o_ref[...] = x.reshape(B, S, D)


# ----------------------------------------------------------------------------
# Wrapper: stack per-layer weights (leading depth axis), cast matmul weights
# to bf16, fold the query scale into Wq, and run the single fused kernel.
# ----------------------------------------------------------------------------
def _stack_params(layer_params, heads, wdtype=jnp.bfloat16):
    D = layer_params[0]["wq"].shape[0]
    hd = D // heads
    scale = 1.0 / math.sqrt(hd)
    stack = lambda name: jnp.stack([p[name] for p in layer_params])
    wqkv = jnp.stack([
        jnp.concatenate([p["wq"] * scale, p["wk"], p["wv"]], axis=1)
        for p in layer_params]).astype(wdtype)                  # (L, D, 3D)
    return dict(
        wqkv=wqkv,
        wo=stack("wo").astype(wdtype),                          # (L, D, D)
        ln1_g=stack("ln1_g"), ln1_b=stack("ln1_b"),             # (L, 1, D) f32
        w1=stack("w1").astype(wdtype), b1=stack("b1"),          # (L, D, M) / (L, 1, M)
        w2=stack("w2").astype(wdtype), b2=stack("b2"),          # (L, M, D) / (L, 1, D)
        ln2_g=stack("ln2_g"), ln2_b=stack("ln2_b"),
    )


def transformer_v2_forward(x, layer_params, *, heads):
    """Equivalent of TransformerV2.forward(x, mask=None) with get_score=False."""
    att_weights = []                                   # get_score=False
    depth = len(layer_params)
    if depth == 0:
        return x, att_weights

    sp = _stack_params(layer_params, heads)
    B, S, D = x.shape
    kernel = functools.partial(_transformer_kernel,
                               depth=depth, heads=heads, eps=1e-5)
    out = pl.pallas_call(
        kernel,
        out_shape=jax.ShapeDtypeStruct((B, S, D), jnp.float32),
        # No grid: single step, whole (B,S,D) block + all stacked weights in
        # VMEM (~100 KB -- far under the scoped limit on v5e/v6e/v7x).
        compiler_params=pltpu.CompilerParams(
            vmem_limit_bytes=32 * 1024 * 1024),
    )(x, sp["wqkv"], sp["wo"], sp["ln1_g"], sp["ln1_b"],
      sp["w1"], sp["b1"], sp["w2"], sp["b2"], sp["ln2_g"], sp["ln2_b"])
    return out, att_weights


# ----------------------------------------------------------------------------
# Pure-JAX reference (mirrors PyTorch semantics).  matmul_dtype / gelu_approx
# let the same function serve as
#   (a) the exact f32 semantic reference (erf GELU) and
#   (b) a precision-matched reference for the bf16-MXU / tanh-GELU kernel.
# ----------------------------------------------------------------------------
def _reference_forward(x, layer_params, *, heads, matmul_dtype=jnp.float32,
                       gelu_approx=False):
    eps = 1e-5

    def layernorm(v, g, b):
        mu = jnp.mean(v, axis=-1, keepdims=True)
        var = jnp.mean((v - mu) ** 2, axis=-1, keepdims=True)
        return (v - mu) / jnp.sqrt(var + eps) * g + b

    def mm(a, b):
        return jnp.dot(a.astype(matmul_dtype), b.astype(matmul_dtype),
                       preferred_element_type=jnp.float32)

    B, S, D = x.shape
    hd = D // heads
    scale = 1.0 / math.sqrt(hd)

    for p in layer_params:
        xn = layernorm(x, p["ln1_g"][0], p["ln1_b"][0]).reshape(B * S, D)
        q = mm(xn, p["wq"] * scale).reshape(B, S, heads, hd).transpose(0, 2, 1, 3)
        k = mm(xn, p["wk"]).reshape(B, S, heads, hd).transpose(0, 2, 1, 3)
        v = mm(xn, p["wv"]).reshape(B, S, heads, hd).transpose(0, 2, 1, 3)
        s = jnp.einsum("bhqd,bhkd->bhqk",
                       q.astype(matmul_dtype), k.astype(matmul_dtype),
                       preferred_element_type=jnp.float32)
        a = jax.nn.softmax(s, axis=-1)
        o = jnp.einsum("bhqk,bhkd->bhqd",
                       a.astype(matmul_dtype), v.astype(matmul_dtype),
                       preferred_element_type=jnp.float32)
        o = o.transpose(0, 2, 1, 3).reshape(B * S, D)
        x = x + mm(o, p["wo"]).reshape(B, S, D)

        xn2 = layernorm(x, p["ln2_g"][0], p["ln2_b"][0]).reshape(B * S, D)
        h = jax.nn.gelu(mm(xn2, p["w1"]) + p["b1"][0], approximate=gelu_approx)
        x = x + (mm(h, p["w2"]) + p["b2"][0]).reshape(B, S, D)
    return x


# ----------------------------------------------------------------------------
# Deterministic parameter construction (shapes follow the PyTorch module).
# ----------------------------------------------------------------------------
def make_params(key, depth, dim, mlp_dim):
    layers = []
    for d in range(depth):
        ks = jax.random.split(jax.random.fold_in(key, d), 8)
        scale = 1.0 / math.sqrt(dim)
        layers.append(dict(
            # MultiheadAttention(dim, heads, bias=False): in_proj, out_proj
            wq=jax.random.normal(ks[0], (dim, dim), jnp.float32) * scale,
            wk=jax.random.normal(ks[1], (dim, dim), jnp.float32) * scale,
            wv=jax.random.normal(ks[2], (dim, dim), jnp.float32) * scale,
            wo=jax.random.normal(ks[3], (dim, dim), jnp.float32) * scale,
            ln1_g=jnp.ones((1, dim), jnp.float32),
            ln1_b=jnp.zeros((1, dim), jnp.float32),
            # FeedForward: Linear(dim, mlp_dim) -> GELU -> Linear(mlp_dim, dim)
            w1=jax.random.normal(ks[4], (dim, mlp_dim), jnp.float32) * scale,
            b1=jax.random.normal(ks[5], (1, mlp_dim), jnp.float32) * 0.01,
            w2=jax.random.normal(ks[6], (mlp_dim, dim), jnp.float32)
               * (1.0 / math.sqrt(mlp_dim)),
            b2=jax.random.normal(ks[7], (1, dim), jnp.float32) * 0.01,
            ln2_g=jnp.ones((1, dim), jnp.float32),
            ln2_b=jnp.zeros((1, dim), jnp.float32),
        ))
    return layers


if __name__ == "__main__":
    # TransformerV2(dim=32, depth=2, heads=4, dim_head=8, mlp_dim=64)
    B, S, DIM, DEPTH, HEADS, MLP = 2, 8, 32, 2, 4, 64

    key = jax.random.PRNGKey(0)
    kx, kp = jax.random.split(key)
    x = jax.random.normal(kx, (B, S, DIM), jnp.float32)
    layer_params = make_params(kp, DEPTH, DIM, MLP)

    out, att_weights = transformer_v2_forward(x, layer_params, heads=HEADS)
    out = jax.block_until_ready(out)

    # Precision-matched reference (bf16 matmul inputs, tanh GELU, f32 accum).
    ref_bf16 = _reference_forward(x, layer_params, heads=HEADS,
                                  matmul_dtype=jnp.bfloat16, gelu_approx=True)
    # Full-precision semantic reference (mirrors PyTorch f32 math, exact GELU).
    ref_f32 = _reference_forward(x, layer_params, heads=HEADS,
                                 matmul_dtype=jnp.float32, gelu_approx=False)

    assert out.shape == (B, S, DIM)
    assert att_weights == []          # get_score=False -> no attention maps
    assert bool(jnp.all(jnp.isfinite(out)))
    assert bool(jnp.allclose(out, ref_bf16, rtol=2e-2, atol=2e-2)), (
        "mismatch vs bf16-matched reference: %e"
        % float(jnp.max(jnp.abs(out - ref_bf16))))
    assert bool(jnp.allclose(out, ref_f32, rtol=1e-1, atol=1e-1)), (
        "mismatch vs f32 reference: %e"
        % float(jnp.max(jnp.abs(out - ref_f32))))

    print("KERNEL_OK")
</pallas_src>

<mosaic_0001>
module attributes {stable_mosaic.version = 11 : i64} {
  func.func @_transformer_kernel(%arg0: memref<2x8x32xf32, #tpu.memory_space<vmem>>, %arg1: memref<2x32x96xbf16, #tpu.memory_space<vmem>>, %arg2: memref<2x32x32xbf16, #tpu.memory_space<vmem>>, %arg3: memref<2x1x32xf32, #tpu.memory_space<vmem>>, %arg4: memref<2x1x32xf32, #tpu.memory_space<vmem>>, %arg5: memref<2x32x64xbf16, #tpu.memory_space<vmem>>, %arg6: memref<2x1x64xf32, #tpu.memory_space<vmem>>, %arg7: memref<2x64x32xbf16, #tpu.memory_space<vmem>>, %arg8: memref<2x1x32xf32, #tpu.memory_space<vmem>>, %arg9: memref<2x1x32xf32, #tpu.memory_space<vmem>>, %arg10: memref<2x1x32xf32, #tpu.memory_space<vmem>>, %arg11: memref<2x8x32xf32, #tpu.memory_space<vmem>>) attributes {dimension_semantics = [], scalar_prefetch = 0 : i64, scratch_operands = 0 : i64, tpu.core_type = #tpu.core_type<tc>} {
    %c0 = arith.constant 0 : index
    %c0_0 = arith.constant 0 : index
    %c0_1 = arith.constant 0 : index
    %0 = vector.load %arg0[%c0, %c0_0, %c0_1] : memref<2x8x32xf32, #tpu.memory_space<vmem>>, vector<2x8x32xf32>
    %1 = vector.shape_cast %0 : vector<2x8x32xf32> to vector<16x32xf32>
    %c0_2 = arith.constant 0 : index
    %c0_3 = arith.constant 0 : index
    %c0_4 = arith.constant 0 : index
    %2 = vector.load %arg3[%c0_2, %c0_3, %c0_4] : memref<2x1x32xf32, #tpu.memory_space<vmem>>, vector<1x1x32xf32>
    %3 = vector.shape_cast %2 : vector<1x1x32xf32> to vector<1x32xf32>
    %c0_5 = arith.constant 0 : index
    %c0_6 = arith.constant 0 : index
    %c0_7 = arith.constant 0 : index
    %4 = vector.load %arg4[%c0_5, %c0_6, %c0_7] : memref<2x1x32xf32, #tpu.memory_space<vmem>>, vector<1x1x32xf32>
    %5 = vector.shape_cast %4 : vector<1x1x32xf32> to vector<1x32xf32>
    %cst = arith.constant dense<0.000000e+00> : vector<16xf32>
    %6 = vector.multi_reduction <add>, %1, %cst [1] : vector<16x32xf32> to vector<16xf32>
    %7 = vector.shape_cast %6 : vector<16xf32> to vector<16x1xf32>
    %cst_8 = arith.constant 3.200000e+01 : f32
    %8 = vector.broadcast %cst_8 : f32 to vector<16x1xf32>
    %9 = arith.divf %7, %8 : vector<16x1xf32>
    %10 = vector.broadcast %9 : vector<16x1xf32> to vector<16x32xf32>
    %11 = arith.subf %1, %10 : vector<16x32xf32>
    %12 = arith.mulf %11, %11 : vector<16x32xf32>
    %cst_9 = arith.constant dense<0.000000e+00> : vector<16xf32>
    %13 = vector.multi_reduction <add>, %12, %cst_9 [1] : vector<16x32xf32> to vector<16xf32>
    %14 = vector.shape_cast %13 : vector<16xf32> to vector<16x1xf32>
    %cst_10 = arith.constant 3.200000e+01 : f32
    %15 = vector.broadcast %cst_10 : f32 to vector<16x1xf32>
    %16 = arith.divf %14, %15 : vector<16x1xf32>
    %17 = vector.broadcast %9 : vector<16x1xf32> to vector<16x32xf32>
    %18 = arith.subf %1, %17 : vector<16x32xf32>
    %cst_11 = arith.constant 9.99999974E-6 : f32
    %19 = vector.broadcast %cst_11 : f32 to vector<16x1xf32>
    %20 = arith.addf %16, %19 : vector<16x1xf32>
    %21 = math.rsqrt %20 : vector<16x1xf32>
    %22 = vector.broadcast %21 : vector<16x1xf32> to vector<16x32xf32>
    %23 = arith.mulf %18, %22 : vector<16x32xf32>
    %24 = vector.broadcast %3 : vector<1x32xf32> to vector<16x32xf32>
    %25 = arith.mulf %23, %24 : vector<16x32xf32>
    %26 = vector.broadcast %5 : vector<1x32xf32> to vector<16x32xf32>
    %27 = arith.addf %25, %26 : vector<16x32xf32>
    %28 = arith.truncf %27 : vector<16x32xf32> to vector<16x32xbf16>
    %c0_12 = arith.constant 0 : index
    %c0_13 = arith.constant 0 : index
    %c0_14 = arith.constant 0 : index
    %29 = vector.load %arg1[%c0_12, %c0_13, %c0_14] : memref<2x32x96xbf16, #tpu.memory_space<vmem>>, vector<1x32x96xbf16>
    %30 = vector.shape_cast %29 : vector<1x32x96xbf16> to vector<32x96xbf16>
    %cst_15 = arith.constant dense<0.000000e+00> : vector<16x96xf32>
    %31 = tpu.matmul %28, %30, %cst_15 {dimension_numbers = #tpu.dot_dimension_numbers<[1], [0], [0], [1], [0, 0, 1, 1], [], []>} : vector<16x32xbf16>, vector<32x96xbf16>, vector<16x96xf32> -> vector<16x96xf32>
    %32 = arith.truncf %31 : vector<16x96xf32> to vector<16x96xbf16>
    %33 = vector.extract_strided_slice %32 {offsets = [0, 0], sizes = [16, 8], strides = [1, 1]} : vector<16x96xbf16> to vector<16x8xbf16>
    %34 = vector.shape_cast %33 : vector<16x8xbf16> to vector<2x8x8xbf16>
    %35 = vector.extract_strided_slice %32 {offsets = [0, 8], sizes = [16, 8], strides = [1, 1]} : vector<16x96xbf16> to vector<16x8xbf16>
    %36 = vector.shape_cast %35 : vector<16x8xbf16> to vector<2x8x8xbf16>
    %37 = vector.extract_strided_slice %32 {offsets = [0, 16], sizes = [16, 8], strides = [1, 1]} : vector<16x96xbf16> to vector<16x8xbf16>
    %38 = vector.shape_cast %37 : vector<16x8xbf16> to vector<2x8x8xbf16>
    %39 = vector.extract_strided_slice %32 {offsets = [0, 24], sizes = [16, 8], strides = [1, 1]} : vector<16x96xbf16> to vector<16x8xbf16>
    %40 = vector.shape_cast %39 : vector<16x8xbf16> to vector<2x8x8xbf16>
    %41 = tpu.concatenate %34, %36, %38, %40 in 0 : vector<2x8x8xbf16>, vector<2x8x8xbf16>, vector<2x8x8xbf16>, vector<2x8x8xbf16> -> vector<8x8x8xbf16>
    %42 = vector.extract_strided_slice %32 {offsets = [0, 32], sizes = [16, 8], strides = [1, 1]} : vector<16x96xbf16> to vector<16x8xbf16>
    %43 = vector.shape_cast %42 : vector<16x8xbf16> to vector<2x8x8xbf16>
    %44 = vector.extract_strided_slice %32 {offsets = [0, 40], sizes = [16, 8], strides = [1, 1]} : vector<16x96xbf16> to vector<16x8xbf16>
    %45 = vector.shape_cast %44 : vector<16x8xbf16> to vector<2x8x8xbf16>
    %46 = vector.extract_strided_slice %32 {offsets = [0, 48], sizes = [16, 8], strides = [1, 1]} : vector<16x96xbf16> to vector<16x8xbf16>
    %47 = vector.shape_cast %46 : vector<16x8xbf16> to vector<2x8x8xbf16>
    %48 = vector.extract_strided_slice %32 {offsets = [0, 56], sizes = [16, 8], strides = [1, 1]} : vector<16x96xbf16> to vector<16x8xbf16>
    %49 = vector.shape_cast %48 : vector<16x8xbf16> to vector<2x8x8xbf16>
    %50 = tpu.concatenate %43, %45, %47, %49 in 0 : vector<2x8x8xbf16>, vector<2x8x8xbf16>, vector<2x8x8xbf16>, vector<2x8x8xbf16> -> vector<8x8x8xbf16>
    %51 = vector.extract_strided_slice %32 {offsets = [0, 64], sizes = [16, 8], strides = [1, 1]} : vector<16x96xbf16> to vector<16x8xbf16>
    %52 = vector.shape_cast %51 : vector<16x8xbf16> to vector<2x8x8xbf16>
    %53 = vector.extract_strided_slice %32 {offsets = [0, 72], sizes = [16, 8], strides = [1, 1]} : vector<16x96xbf16> to vector<16x8xbf16>
    %54 = vector.shape_cast %53 : vector<16x8xbf16> to vector<2x8x8xbf16>
    %55 = vector.extract_strided_slice %32 {offsets = [0, 80], sizes = [16, 8], strides = [1, 1]} : vector<16x96xbf16> to vector<16x8xbf16>
    %56 = vector.shape_cast %55 : vector<16x8xbf16> to vector<2x8x8xbf16>
    %57 = vector.extract_strided_slice %32 {offsets = [0, 88], sizes = [16, 8], strides = [1, 1]} : vector<16x96xbf16> to vector<16x8xbf16>
    %58 = vector.shape_cast %57 : vector<16x8xbf16> to vector<2x8x8xbf16>
    %59 = tpu.concatenate %52, %54, %56, %58 in 0 : vector<2x8x8xbf16>, vector<2x8x8xbf16>, vector<2x8x8xbf16>, vector<2x8x8xbf16> -> vector<8x8x8xbf16>
    "tpu.trace_start"() <{level = 10 : i32, message = "bqd,bkd->bqk"}> : () -> ()
    %cst_16 = arith.constant dense<0.000000e+00> : vector<8x8x8xf32>
    %60 = tpu.matmul %41, %50, %cst_16 {dimension_numbers = #tpu.dot_dimension_numbers<[2], [2], [1], [1], [0, 0, 0, 1, 1, 1], [0], [0]>} : vector<8x8x8xbf16>, vector<8x8x8xbf16>, vector<8x8x8xf32> -> vector<8x8x8xf32>
    "tpu.trace_stop"() : () -> ()
    %cst_17 = arith.constant dense<0xFF800000> : vector<8x8xf32>
    %61 = vector.multi_reduction <maximumf>, %60, %cst_17 [2] : vector<8x8x8xf32> to vector<8x8xf32>
    %62 = vector.shape_cast %61 : vector<8x8xf32> to vector<8x8x1xf32>
    %63 = vector.broadcast %62 : vector<8x8x1xf32> to vector<8x8x8xf32>
    %64 = arith.subf %60, %63 : vector<8x8x8xf32>
    %65 = math.exp %64 : vector<8x8x8xf32>
    %cst_18 = arith.constant dense<0.000000e+00> : vector<8x8xf32>
    %66 = vector.multi_reduction <add>, %65, %cst_18 [2] : vector<8x8x8xf32> to vector<8x8xf32>
    %67 = vector.shape_cast %66 : vector<8x8xf32> to vector<8x8x1xf32>
    %68 = tpu.reciprocal %67 {approx = true} : vector<8x8x1xf32> -> vector<8x8x1xf32>
    %69 = vector.broadcast %68 : vector<8x8x1xf32> to vector<8x8x8xf32>
    %70 = arith.mulf %65, %69 : vector<8x8x8xf32>
    %71 = arith.truncf %70 : vector<8x8x8xf32> to vector<8x8x8xbf16>
    "tpu.trace_start"() <{level = 10 : i32, message = "bqk,bkd->bqd"}> : () -> ()
    %cst_19 = arith.constant dense<0.000000e+00> : vector<8x8x8xf32>
    %72 = tpu.matmul %71, %59, %cst_19 {dimension_numbers = #tpu.dot_dimension_numbers<[2], [1], [1], [2], [0, 0, 0, 1, 1, 2], [0], [0]>} : vector<8x8x8xbf16>, vector<8x8x8xbf16>, vector<8x8x8xf32> -> vector<8x8x8xf32>
    "tpu.trace_stop"() : () -> ()
    %73 = vector.extract_strided_slice %72 {offsets = [0, 0, 0], sizes = [2, 8, 8], strides = [1, 1, 1]} : vector<8x8x8xf32> to vector<2x8x8xf32>
    %74 = vector.extract_strided_slice %72 {offsets = [2, 0, 0], sizes = [2, 8, 8], strides = [1, 1, 1]} : vector<8x8x8xf32> to vector<2x8x8xf32>
    %75 = vector.extract_strided_slice %72 {offsets = [4, 0, 0], sizes = [2, 8, 8], strides = [1, 1, 1]} : vector<8x8x8xf32> to vector<2x8x8xf32>
    %76 = vector.extract_strided_slice %72 {offsets = [6, 0, 0], sizes = [2, 8, 8], strides = [1, 1, 1]} : vector<8x8x8xf32> to vector<2x8x8xf32>
    %77 = tpu.concatenate %73, %74, %75, %76 in 2 : vector<2x8x8xf32>, vector<2x8x8xf32>, vector<2x8x8xf32>, vector<2x8x8xf32> -> vector<2x8x32xf32>
    %78 = vector.shape_cast %77 : vector<2x8x32xf32> to vector<16x32xf32>
    %79 = arith.truncf %78 : vector<16x32xf32> to vector<16x32xbf16>
    %c0_20 = arith.constant 0 : index
    %c0_21 = arith.constant 0 : index
    %c0_22 = arith.constant 0 : index
    %80 = vector.load %arg2[%c0_20, %c0_21, %c0_22] : memref<2x32x32xbf16, #tpu.memory_space<vmem>>, vector<1x32x32xbf16>
    %81 = vector.shape_cast %80 : vector<1x32x32xbf16> to vector<32x32xbf16>
    %cst_23 = arith.constant dense<0.000000e+00> : vector<16x32xf32>
    %82 = tpu.matmul %79, %81, %cst_23 {dimension_numbers = #tpu.dot_dimension_numbers<[1], [0], [0], [1], [0, 0, 1, 1], [], []>} : vector<16x32xbf16>, vector<32x32xbf16>, vector<16x32xf32> -> vector<16x32xf32>
    %83 = arith.addf %1, %82 : vector<16x32xf32>
    %c0_24 = arith.constant 0 : index
    %c0_25 = arith.constant 0 : index
    %c0_26 = arith.constant 0 : index
    %84 = vector.load %arg9[%c0_24, %c0_25, %c0_26] : memref<2x1x32xf32, #tpu.memory_space<vmem>>, vector<1x1x32xf32>
    %85 = vector.shape_cast %84 : vector<1x1x32xf32> to vector<1x32xf32>
    %c0_27 = arith.constant 0 : index
    %c0_28 = arith.constant 0 : index
    %c0_29 = arith.constant 0 : index
    %86 = vector.load %arg10[%c0_27, %c0_28, %c0_29] : memref<2x1x32xf32, #tpu.memory_space<vmem>>, vector<1x1x32xf32>
    %87 = vector.shape_cast %86 : vector<1x1x32xf32> to vector<1x32xf32>
    %cst_30 = arith.constant dense<0.000000e+00> : vector<16xf32>
    %88 = vector.multi_reduction <add>, %83, %cst_30 [1] : vector<16x32xf32> to vector<16xf32>
    %89 = vector.shape_cast %88 : vector<16xf32> to vector<16x1xf32>
    %cst_31 = arith.constant 3.200000e+01 : f32
    %90 = vector.broadcast %cst_31 : f32 to vector<16x1xf32>
    %91 = arith.divf %89, %90 : vector<16x1xf32>
    %92 = vector.broadcast %91 : vector<16x1xf32> to vector<16x32xf32>
    %93 = arith.subf %83, %92 : vector<16x32xf32>
    %94 = arith.mulf %93, %93 : vector<16x32xf32>
    %cst_32 = arith.constant dense<0.000000e+00> : vector<16xf32>
    %95 = vector.multi_reduction <add>, %94, %cst_32 [1] : vector<16x32xf32> to vector<16xf32>
    %96 = vector.shape_cast %95 : vector<16xf32> to vector<16x1xf32>
    %cst_33 = arith.constant 3.200000e+01 : f32
    %97 = vector.broadcast %cst_33 : f32 to vector<16x1xf32>
    %98 = arith.divf %96, %97 : vector<16x1xf32>
    %99 = vector.broadcast %91 : vector<16x1xf32> to vector<16x32xf32>
    %100 = arith.subf %83, %99 : vector<16x32xf32>
    %cst_34 = arith.constant 9.99999974E-6 : f32
    %101 = vector.broadcast %cst_34 : f32 to vector<16x1xf32>
    %102 = arith.addf %98, %101 : vector<16x1xf32>
    %103 = math.rsqrt %102 : vector<16x1xf32>
    %104 = vector.broadcast %103 : vector<16x1xf32> to vector<16x32xf32>
    %105 = arith.mulf %100, %104 : vector<16x32xf32>
    %106 = vector.broadcast %85 : vector<1x32xf32> to vector<16x32xf32>
    %107 = arith.mulf %105, %106 : vector<16x32xf32>
    %108 = vector.broadcast %87 : vector<1x32xf32> to vector<16x32xf32>
    %109 = arith.addf %107, %108 : vector<16x32xf32>
    %110 = arith.truncf %109 : vector<16x32xf32> to vector<16x32xbf16>
    %c0_35 = arith.constant 0 : index
    %c0_36 = arith.constant 0 : index
    %c0_37 = arith.constant 0 : index
    %111 = vector.load %arg5[%c0_35, %c0_36, %c0_37] : memref<2x32x64xbf16, #tpu.memory_space<vmem>>, vector<1x32x64xbf16>
    %112 = vector.shape_cast %111 : vector<1x32x64xbf16> to vector<32x64xbf16>
    %cst_38 = arith.constant dense<0.000000e+00> : vector<16x64xf32>
    %113 = tpu.matmul %110, %112, %cst_38 {dimension_numbers = #tpu.dot_dimension_numbers<[1], [0], [0], [1], [0, 0, 1, 1], [], []>} : vector<16x32xbf16>, vector<32x64xbf16>, vector<16x64xf32> -> vector<16x64xf32>
    %c0_39 = arith.constant 0 : index
    %c0_40 = arith.constant 0 : index
    %c0_41 = arith.constant 0 : index
    %114 = vector.load %arg6[%c0_39, %c0_40, %c0_41] : memref<2x1x64xf32, #tpu.memory_space<vmem>>, vector<1x1x64xf32>
    %115 = vector.shape_cast %114 : vector<1x1x64xf32> to vector<1x64xf32>
    %116 = vector.broadcast %115 : vector<1x64xf32> to vector<16x64xf32>
    %117 = arith.addf %113, %116 : vector<16x64xf32>
    %118 = arith.mulf %117, %117 : vector<16x64xf32>
    %119 = arith.mulf %117, %118 : vector<16x64xf32>
    %cst_42 = arith.constant 4.471500e-02 : f32
    %120 = vector.broadcast %cst_42 : f32 to vector<16x64xf32>
    %121 = arith.mulf %120, %119 : vector<16x64xf32>
    %122 = arith.addf %117, %121 : vector<16x64xf32>
    %cst_43 = arith.constant 0.797884583 : f32
    %123 = vector.broadcast %cst_43 : f32 to vector<16x64xf32>
    %124 = arith.mulf %123, %122 : vector<16x64xf32>
    %125 = math.tanh %124 : vector<16x64xf32>
    %cst_44 = arith.constant 1.000000e+00 : f32
    %126 = vector.broadcast %cst_44 : f32 to vector<16x64xf32>
    %127 = arith.addf %126, %125 : vector<16x64xf32>
    %cst_45 = arith.constant 5.000000e-01 : f32
    %128 = vector.broadcast %cst_45 : f32 to vector<16x64xf32>
    %129 = arith.mulf %128, %127 : vector<16x64xf32>
    %130 = arith.mulf %117, %129 : vector<16x64xf32>
    %131 = arith.truncf %130 : vector<16x64xf32> to vector<16x64xbf16>
    %c0_46 = arith.constant 0 : index
    %c0_47 = arith.constant 0 : index
    %c0_48 = arith.constant 0 : index
    %132 = vector.load %arg7[%c0_46, %c0_47, %c0_48] : memref<2x64x32xbf16, #tpu.memory_space<vmem>>, vector<1x64x32xbf16>
    %133 = vector.shape_cast %132 : vector<1x64x32xbf16> to vector<64x32xbf16>
    %cst_49 = arith.constant dense<0.000000e+00> : vector<16x32xf32>
    %134 = tpu.matmul %131, %133, %cst_49 {dimension_numbers = #tpu.dot_dimension_numbers<[1], [0], [0], [1], [0, 0, 1, 1], [], []>} : vector<16x64xbf16>, vector<64x32xbf16>, vector<16x32xf32> -> vector<16x32xf32>
    %c0_50 = arith.constant 0 : index
    %c0_51 = arith.constant 0 : index
    %c0_52 = arith.constant 0 : index
    %135 = vector.load %arg8[%c0_50, %c0_51, %c0_52] : memref<2x1x32xf32, #tpu.memory_space<vmem>>, vector<1x1x32xf32>
    %136 = vector.shape_cast %135 : vector<1x1x32xf32> to vector<1x32xf32>
    %137 = vector.broadcast %136 : vector<1x32xf32> to vector<16x32xf32>
    %138 = arith.addf %134, %137 : vector<16x32xf32>
    %139 = arith.addf %83, %138 : vector<16x32xf32>
    %c1 = arith.constant 1 : index
    %c0_53 = arith.constant 0 : index
    %c0_54 = arith.constant 0 : index
    %140 = vector.load %arg3[%c1, %c0_53, %c0_54] : memref<2x1x32xf32, #tpu.memory_space<vmem>>, vector<1x1x32xf32>
    %141 = vector.shape_cast %140 : vector<1x1x32xf32> to vector<1x32xf32>
    %c1_55 = arith.constant 1 : index
    %c0_56 = arith.constant 0 : index
    %c0_57 = arith.constant 0 : index
    %142 = vector.load %arg4[%c1_55, %c0_56, %c0_57] : memref<2x1x32xf32, #tpu.memory_space<vmem>>, vector<1x1x32xf32>
    %143 = vector.shape_cast %142 : vector<1x1x32xf32> to vector<1x32xf32>
    %cst_58 = arith.constant dense<0.000000e+00> : vector<16xf32>
    %144 = vector.multi_reduction <add>, %139, %cst_58 [1] : vector<16x32xf32> to vector<16xf32>
    %145 = vector.shape_cast %144 : vector<16xf32> to vector<16x1xf32>
    %cst_59 = arith.constant 3.200000e+01 : f32
    %146 = vector.broadcast %cst_59 : f32 to vector<16x1xf32>
    %147 = arith.divf %145, %146 : vector<16x1xf32>
    %148 = vector.broadcast %147 : vector<16x1xf32> to vector<16x32xf32>
    %149 = arith.subf %139, %148 : vector<16x32xf32>
    %150 = arith.mulf %149, %149 : vector<16x32xf32>
    %cst_60 = arith.constant dense<0.000000e+00> : vector<16xf32>
    %151 = vector.multi_reduction <add>, %150, %cst_60 [1] : vector<16x32xf32> to vector<16xf32>
    %152 = vector.shape_cast %151 : vector<16xf32> to vector<16x1xf32>
    %cst_61 = arith.constant 3.200000e+01 : f32
    %153 = vector.broadcast %cst_61 : f32 to vector<16x1xf32>
    %154 = arith.divf %152, %153 : vector<16x1xf32>
    %155 = vector.broadcast %147 : vector<16x1xf32> to vector<16x32xf32>
    %156 = arith.subf %139, %155 : vector<16x32xf32>
    %cst_62 = arith.constant 9.99999974E-6 : f32
    %157 = vector.broadcast %cst_62 : f32 to vector<16x1xf32>
    %158 = arith.addf %154, %157 : vector<16x1xf32>
    %159 = math.rsqrt %158 : vector<16x1xf32>
    %160 = vector.broadcast %159 : vector<16x1xf32> to vector<16x32xf32>
    %161 = arith.mulf %156, %160 : vector<16x32xf32>
    %162 = vector.broadcast %141 : vector<1x32xf32> to vector<16x32xf32>
    %163 = arith.mulf %161, %162 : vector<16x32xf32>
    %164 = vector.broadcast %143 : vector<1x32xf32> to vector<16x32xf32>
    %165 = arith.addf %163, %164 : vector<16x32xf32>
    %166 = arith.truncf %165 : vector<16x32xf32> to vector<16x32xbf16>
    %c1_63 = arith.constant 1 : index
    %c0_64 = arith.constant 0 : index
    %c0_65 = arith.constant 0 : index
    %167 = vector.load %arg1[%c1_63, %c0_64, %c0_65] : memref<2x32x96xbf16, #tpu.memory_space<vmem>>, vector<1x32x96xbf16>
    %168 = vector.shape_cast %167 : vector<1x32x96xbf16> to vector<32x96xbf16>
    %cst_66 = arith.constant dense<0.000000e+00> : vector<16x96xf32>
    %169 = tpu.matmul %166, %168, %cst_66 {dimension_numbers = #tpu.dot_dimension_numbers<[1], [0], [0], [1], [0, 0, 1, 1], [], []>} : vector<16x32xbf16>, vector<32x96xbf16>, vector<16x96xf32> -> vector<16x96xf32>
    %170 = arith.truncf %169 : vector<16x96xf32> to vector<16x96xbf16>
    %171 = vector.extract_strided_slice %170 {offsets = [0, 0], sizes = [16, 8], strides = [1, 1]} : vector<16x96xbf16> to vector<16x8xbf16>
    %172 = vector.shape_cast %171 : vector<16x8xbf16> to vector<2x8x8xbf16>
    %173 = vector.extract_strided_slice %170 {offsets = [0, 8], sizes = [16, 8], strides = [1, 1]} : vector<16x96xbf16> to vector<16x8xbf16>
    %174 = vector.shape_cast %173 : vector<16x8xbf16> to vector<2x8x8xbf16>
    %175 = vector.extract_strided_slice %170 {offsets = [0, 16], sizes = [16, 8], strides = [1, 1]} : vector<16x96xbf16> to vector<16x8xbf16>
    %176 = vector.shape_cast %175 : vector<16x8xbf16> to vector<2x8x8xbf16>
    %177 = vector.extract_strided_slice %170 {offsets = [0, 24], sizes = [16, 8], strides = [1, 1]} : vector<16x96xbf16> to vector<16x8xbf16>
    %178 = vector.shape_cast %177 : vector<16x8xbf16> to vector<2x8x8xbf16>
    %179 = tpu.concatenate %172, %174, %176, %178 in 0 : vector<2x8x8xbf16>, vector<2x8x8xbf16>, vector<2x8x8xbf16>, vector<2x8x8xbf16> -> vector<8x8x8xbf16>
    %180 = vector.extract_strided_slice %170 {offsets = [0, 32], sizes = [16, 8], strides = [1, 1]} : vector<16x96xbf16> to vector<16x8xbf16>
    %181 = vector.shape_cast %180 : vector<16x8xbf16> to vector<2x8x8xbf16>
    %182 = vector.extract_strided_slice %170 {offsets = [0, 40], sizes = [16, 8], strides = [1, 1]} : vector<16x96xbf16> to vector<16x8xbf16>
    %183 = vector.shape_cast %182 : vector<16x8xbf16> to vector<2x8x8xbf16>
    %184 = vector.extract_strided_slice %170 {offsets = [0, 48], sizes = [16, 8], strides = [1, 1]} : vector<16x96xbf16> to vector<16x8xbf16>
    %185 = vector.shape_cast %184 : vector<16x8xbf16> to vector<2x8x8xbf16>
    %186 = vector.extract_strided_slice %170 {offsets = [0, 56], sizes = [16, 8], strides = [1, 1]} : vector<16x96xbf16> to vector<16x8xbf16>
    %187 = vector.shape_cast %186 : vector<16x8xbf16> to vector<2x8x8xbf16>
    %188 = tpu.concatenate %181, %183, %185, %187 in 0 : vector<2x8x8xbf16>, vector<2x8x8xbf16>, vector<2x8x8xbf16>, vector<2x8x8xbf16> -> vector<8x8x8xbf16>
    %189 = vector.extract_strided_slice %170 {offsets = [0, 64], sizes = [16, 8], strides = [1, 1]} : vector<16x96xbf16> to vector<16x8xbf16>
    %190 = vector.shape_cast %189 : vector<16x8xbf16> to vector<2x8x8xbf16>
    %191 = vector.extract_strided_slice %170 {offsets = [0, 72], sizes = [16, 8], strides = [1, 1]} : vector<16x96xbf16> to vector<16x8xbf16>
    %192 = vector.shape_cast %191 : vector<16x8xbf16> to vector<2x8x8xbf16>
    %193 = vector.extract_strided_slice %170 {offsets = [0, 80], sizes = [16, 8], strides = [1, 1]} : vector<16x96xbf16> to vector<16x8xbf16>
    %194 = vector.shape_cast %193 : vector<16x8xbf16> to vector<2x8x8xbf16>
    %195 = vector.extract_strided_slice %170 {offsets = [0, 88], sizes = [16, 8], strides = [1, 1]} : vector<16x96xbf16> to vector<16x8xbf16>
    %196 = vector.shape_cast %195 : vector<16x8xbf16> to vector<2x8x8xbf16>
    %197 = tpu.concatenate %190, %192, %194, %196 in 0 : vector<2x8x8xbf16>, vector<2x8x8xbf16>, vector<2x8x8xbf16>, vector<2x8x8xbf16> -> vector<8x8x8xbf16>
    "tpu.trace_start"() <{level = 10 : i32, message = "bqd,bkd->bqk"}> : () -> ()
    %cst_67 = arith.constant dense<0.000000e+00> : vector<8x8x8xf32>
    %198 = tpu.matmul %179, %188, %cst_67 {dimension_numbers = #tpu.dot_dimension_numbers<[2], [2], [1], [1], [0, 0, 0, 1, 1, 1], [0], [0]>} : vector<8x8x8xbf16>, vector<8x8x8xbf16>, vector<8x8x8xf32> -> vector<8x8x8xf32>
    "tpu.trace_stop"() : () -> ()
    %cst_68 = arith.constant dense<0xFF800000> : vector<8x8xf32>
    %199 = vector.multi_reduction <maximumf>, %198, %cst_68 [2] : vector<8x8x8xf32> to vector<8x8xf32>
    %200 = vector.shape_cast %199 : vector<8x8xf32> to vector<8x8x1xf32>
    %201 = vector.broadcast %200 : vector<8x8x1xf32> to vector<8x8x8xf32>
    %202 = arith.subf %198, %201 : vector<8x8x8xf32>
    %203 = math.exp %202 : vector<8x8x8xf32>
    %cst_69 = arith.constant dense<0.000000e+00> : vector<8x8xf32>
    %204 = vector.multi_reduction <add>, %203, %cst_69 [2] : vector<8x8x8xf32> to vector<8x8xf32>
    %205 = vector.shape_cast %204 : vector<8x8xf32> to vector<8x8x1xf32>
    %206 = tpu.reciprocal %205 {approx = true} : vector<8x8x1xf32> -> vector<8x8x1xf32>
    %207 = vector.broadcast %206 : vector<8x8x1xf32> to vector<8x8x8xf32>
    %208 = arith.mulf %203, %207 : vector<8x8x8xf32>
    %209 = arith.truncf %208 : vector<8x8x8xf32> to vector<8x8x8xbf16>
    "tpu.trace_start"() <{level = 10 : i32, message = "bqk,bkd->bqd"}> : () -> ()
    %cst_70 = arith.constant dense<0.000000e+00> : vector<8x8x8xf32>
    %210 = tpu.matmul %209, %197, %cst_70 {dimension_numbers = #tpu.dot_dimension_numbers<[2], [1], [1], [2], [0, 0, 0, 1, 1, 2], [0], [0]>} : vector<8x8x8xbf16>, vector<8x8x8xbf16>, vector<8x8x8xf32> -> vector<8x8x8xf32>
    "tpu.trace_stop"() : () -> ()
    %211 = vector.extract_strided_slice %210 {offsets = [0, 0, 0], sizes = [2, 8, 8], strides = [1, 1, 1]} : vector<8x8x8xf32> to vector<2x8x8xf32>
    %212 = vector.extract_strided_slice %210 {offsets = [2, 0, 0], sizes = [2, 8, 8], strides = [1, 1, 1]} : vector<8x8x8xf32> to vector<2x8x8xf32>
    %213 = vector.extract_strided_slice %210 {offsets = [4, 0, 0], sizes = [2, 8, 8], strides = [1, 1, 1]} : vector<8x8x8xf32> to vector<2x8x8xf32>
    %214 = vector.extract_strided_slice %210 {offsets = [6, 0, 0], sizes = [2, 8, 8], strides = [1, 1, 1]} : vector<8x8x8xf32> to vector<2x8x8xf32>
    %215 = tpu.concatenate %211, %212, %213, %214 in 2 : vector<2x8x8xf32>, vector<2x8x8xf32>, vector<2x8x8xf32>, vector<2x8x8xf32> -> vector<2x8x32xf32>
    %216 = vector.shape_cast %215 : vector<2x8x32xf32> to vector<16x32xf32>
    %217 = arith.truncf %216 : vector<16x32xf32> to vector<16x32xbf16>
    %c1_71 = arith.constant 1 : index
    %c0_72 = arith.constant 0 : index
    %c0_73 = arith.constant 0 : index
    %218 = vector.load %arg2[%c1_71, %c0_72, %c0_73] : memref<2x32x32xbf16, #tpu.memory_space<vmem>>, vector<1x32x32xbf16>
    %219 = vector.shape_cast %218 : vector<1x32x32xbf16> to vector<32x32xbf16>
    %cst_74 = arith.constant dense<0.000000e+00> : vector<16x32xf32>
    %220 = tpu.matmul %217, %219, %cst_74 {dimension_numbers = #tpu.dot_dimension_numbers<[1], [0], [0], [1], [0, 0, 1, 1], [], []>} : vector<16x32xbf16>, vector<32x32xbf16>, vector<16x32xf32> -> vector<16x32xf32>
    %221 = arith.addf %139, %220 : vector<16x32xf32>
    %c1_75 = arith.constant 1 : index
    %c0_76 = arith.constant 0 : index
    %c0_77 = arith.constant 0 : index
    %222 = vector.load %arg9[%c1_75, %c0_76, %c0_77] : memref<2x1x32xf32, #tpu.memory_space<vmem>>, vector<1x1x32xf32>
    %223 = vector.shape_cast %222 : vector<1x1x32xf32> to vector<1x32xf32>
    %c1_78 = arith.constant 1 : index
    %c0_79 = arith.constant 0 : index
    %c0_80 = arith.constant 0 : index
    %224 = vector.load %arg10[%c1_78, %c0_79, %c0_80] : memref<2x1x32xf32, #tpu.memory_space<vmem>>, vector<1x1x32xf32>
    %225 = vector.shape_cast %224 : vector<1x1x32xf32> to vector<1x32xf32>
    %cst_81 = arith.constant dense<0.000000e+00> : vector<16xf32>
    %226 = vector.multi_reduction <add>, %221, %cst_81 [1] : vector<16x32xf32> to vector<16xf32>
    %227 = vector.shape_cast %226 : vector<16xf32> to vector<16x1xf32>
    %cst_82 = arith.constant 3.200000e+01 : f32
    %228 = vector.broadcast %cst_82 : f32 to vector<16x1xf32>
    %229 = arith.divf %227, %228 : vector<16x1xf32>
    %230 = vector.broadcast %229 : vector<16x1xf32> to vector<16x32xf32>
    %231 = arith.subf %221, %230 : vector<16x32xf32>
    %232 = arith.mulf %231, %231 : vector<16x32xf32>
    %cst_83 = arith.constant dense<0.000000e+00> : vector<16xf32>
    %233 = vector.multi_reduction <add>, %232, %cst_83 [1] : vector<16x32xf32> to vector<16xf32>
    %234 = vector.shape_cast %233 : vector<16xf32> to vector<16x1xf32>
    %cst_84 = arith.constant 3.200000e+01 : f32
    %235 = vector.broadcast %cst_84 : f32 to vector<16x1xf32>
    %236 = arith.divf %234, %235 : vector<16x1xf32>
    %237 = vector.broadcast %229 : vector<16x1xf32> to vector<16x32xf32>
    %238 = arith.subf %221, %237 : vector<16x32xf32>
    %cst_85 = arith.constant 9.99999974E-6 : f32
    %239 = vector.broadcast %cst_85 : f32 to vector<16x1xf32>
    %240 = arith.addf %236, %239 : vector<16x1xf32>
    %241 = math.rsqrt %240 : vector<16x1xf32>
    %242 = vector.broadcast %241 : vector<16x1xf32> to vector<16x32xf32>
    %243 = arith.mulf %238, %242 : vector<16x32xf32>
    %244 = vector.broadcast %223 : vector<1x32xf32> to vector<16x32xf32>
    %245 = arith.mulf %243, %244 : vector<16x32xf32>
    %246 = vector.broadcast %225 : vector<1x32xf32> to vector<16x32xf32>
    %247 = arith.addf %245, %246 : vector<16x32xf32>
    %248 = arith.truncf %247 : vector<16x32xf32> to vector<16x32xbf16>
    %c1_86 = arith.constant 1 : index
    %c0_87 = arith.constant 0 : index
    %c0_88 = arith.constant 0 : index
    %249 = vector.load %arg5[%c1_86, %c0_87, %c0_88] : memref<2x32x64xbf16, #tpu.memory_space<vmem>>, vector<1x32x64xbf16>
    %250 = vector.shape_cast %249 : vector<1x32x64xbf16> to vector<32x64xbf16>
    %cst_89 = arith.constant dense<0.000000e+00> : vector<16x64xf32>
    %251 = tpu.matmul %248, %250, %cst_89 {dimension_numbers = #tpu.dot_dimension_numbers<[1], [0], [0], [1], [0, 0, 1, 1], [], []>} : vector<16x32xbf16>, vector<32x64xbf16>, vector<16x64xf32> -> vector<16x64xf32>
    %c1_90 = arith.constant 1 : index
    %c0_91 = arith.constant 0 : index
    %c0_92 = arith.constant 0 : index
    %252 = vector.load %arg6[%c1_90, %c0_91, %c0_92] : memref<2x1x64xf32, #tpu.memory_space<vmem>>, vector<1x1x64xf32>
    %253 = vector.shape_cast %252 : vector<1x1x64xf32> to vector<1x64xf32>
    %254 = vector.broadcast %253 : vector<1x64xf32> to vector<16x64xf32>
    %255 = arith.addf %251, %254 : vector<16x64xf32>
    %256 = arith.mulf %255, %255 : vector<16x64xf32>
    %257 = arith.mulf %255, %256 : vector<16x64xf32>
    %cst_93 = arith.constant 4.471500e-02 : f32
    %258 = vector.broadcast %cst_93 : f32 to vector<16x64xf32>
    %259 = arith.mulf %258, %257 : vector<16x64xf32>
    %260 = arith.addf %255, %259 : vector<16x64xf32>
    %cst_94 = arith.constant 0.797884583 : f32
    %261 = vector.broadcast %cst_94 : f32 to vector<16x64xf32>
    %262 = arith.mulf %261, %260 : vector<16x64xf32>
    %263 = math.tanh %262 : vector<16x64xf32>
    %cst_95 = arith.constant 1.000000e+00 : f32
    %264 = vector.broadcast %cst_95 : f32 to vector<16x64xf32>
    %265 = arith.addf %264, %263 : vector<16x64xf32>
    %cst_96 = arith.constant 5.000000e-01 : f32
    %266 = vector.broadcast %cst_96 : f32 to vector<16x64xf32>
    %267 = arith.mulf %266, %265 : vector<16x64xf32>
    %268 = arith.mulf %255, %267 : vector<16x64xf32>
    %269 = arith.truncf %268 : vector<16x64xf32> to vector<16x64xbf16>
    %c1_97 = arith.constant 1 : index
    %c0_98 = arith.constant 0 : index
    %c0_99 = arith.constant 0 : index
    %270 = vector.load %arg7[%c1_97, %c0_98, %c0_99] : memref<2x64x32xbf16, #tpu.memory_space<vmem>>, vector<1x64x32xbf16>
    %271 = vector.shape_cast %270 : vector<1x64x32xbf16> to vector<64x32xbf16>
    %cst_100 = arith.constant dense<0.000000e+00> : vector<16x32xf32>
    %272 = tpu.matmul %269, %271, %cst_100 {dimension_numbers = #tpu.dot_dimension_numbers<[1], [0], [0], [1], [0, 0, 1, 1], [], []>} : vector<16x64xbf16>, vector<64x32xbf16>, vector<16x32xf32> -> vector<16x32xf32>
    %c1_101 = arith.constant 1 : index
    %c0_102 = arith.constant 0 : index
    %c0_103 = arith.constant 0 : index
    %273 = vector.load %arg8[%c1_101, %c0_102, %c0_103] : memref<2x1x32xf32, #tpu.memory_space<vmem>>, vector<1x1x32xf32>
    %274 = vector.shape_cast %273 : vector<1x1x32xf32> to vector<1x32xf32>
    %275 = vector.broadcast %274 : vector<1x32xf32> to vector<16x32xf32>
    %276 = arith.addf %272, %275 : vector<16x32xf32>
    %277 = arith.addf %221, %276 : vector<16x32xf32>
    %278 = vector.shape_cast %277 : vector<16x32xf32> to vector<2x8x32xf32>
    %c0_104 = arith.constant 0 : index
    %c0_105 = arith.constant 0 : index
    %c0_106 = arith.constant 0 : index
    %279 = vector.load %arg11[%c0_104, %c0_105, %c0_106] : memref<2x8x32xf32, #tpu.memory_space<vmem>>, vector<2x8x32xf32>
    tpu.vector_store %arg11[%c0_104, %c0_105, %c0_106], %278 {strides = array<i32>} : memref<2x8x32xf32, #tpu.memory_space<vmem>>, vector<2x8x32xf32>,
    return
  }
}

</mosaic_0001>

<bundles_post_ra>
// kernel: tpu_custom_call.1
= control target key start
LH: loop header
LB: loop body
LE: loop exit
PB: predicated region body
PF: predicated region fallthrough
CT: control target
= control target key end

     0   :  { %16 = vsyncpa [#allocation3], 0  ;;  %s2626_s0 = inlined_call_operand.hbm [shape: f32[2,8,32], index: 0, kind: input, shape index: {}]   ;;  %s2627_s1 = inlined_call_operand.vmem [shape: bf16[2,32,96], index: 1, kind: input, shape index: {}]   ;;  %s2628_s2 = inlined_call_operand.vmem [shape: bf16[2,32,32], index: 2, kind: input, shape index: {}]   ;;  %s2629_s3 = inlined_call_operand.hbm [shape: f32[2,1,32], index: 3, kind: input, shape index: {}]   ;;  %s2630_s4 = inlined_call_operand.vmem [shape: f32[2,1,32], index: 4, kind: input, shape index: {}]   ;;  %s2631_s5 = inlined_call_operand.vmem [shape: bf16[2,32,64], index: 5, kind: input, shape index: {}]   ;;  %s2632_s6 = inlined_call_operand.vmem [shape: f32[2,1,64], index: 6, kind: input, shape index: {}]   ;;  %s2633_s7 = inlined_call_operand.vmem [shape: bf16[2,64,32], index: 7, kind: input, shape index: {}]   ;;  %s2634_s8 = inlined_call_operand.vmem [shape: f32[2,1,32], index: 8, kind: input, shape index: {}]   ;;  %s2635_s9 = inlined_call_operand.hbm [shape: f32[2,1,32], index: 9, kind: input, shape index: {}]   ;;  %s2636_s10 = inlined_call_operand.vmem [shape: f32[2,1,32], index: 10, kind: input, shape index: {}]   ;;  %s2637_s11 = inlined_call_operand.hbm [shape: f32[2,8,32], index: 11, kind: output, shape index: {}]  }
   0x1   :  { %17 = vsyncpa [#allocation6], 0  ;;  %s40_s19 = sshll.u32 %s2629_s3, 4  ;;  %s41_s19 = int_to_ptr.hbm [resolvable:$true] %s40_s19 }
   0x2   :  { %18 = vsyncpa [#allocation4], 0  ;;  %s2123_s20 = smov [#allocation5]   ;;  %s23_s24 = sshll.u32 %s2626_s0, 4  ;;  %s24_s24 = int_to_ptr.hbm [resolvable:$true] %s23_s24 }
   0x3   :  { %s42_s21 = sshll.u32 %s2123_s20, 4  ;;  %s2124_s25 = smov 16   ;;  %s43_s21 = int_to_ptr.vmem [resolvable:$true] %s42_s21 }
   0x4   :  { %s2125_s26 = smov 1   ;;  %s2126_s27 = smov [#allocation2]  }
   0x5   :  { %48 = dma.hbm_to_vmem [thread:$0]  %s41_s19, 32, %s43_s21, [#allocation6], %s2124_s25, %s2124_s25, %s2125_s26  }
   0x6   :  { %s25_s28 = sshll.u32 %s2126_s27, 4  ;;  %s2127_s29 = smov 128   ;;  %s26_s28 = int_to_ptr.vmem [resolvable:$true] %s25_s28 }
   0x7   :  { %s2128_s3 = smov 8   ;;  %s63_s13 = sshll.u32 %s2635_s9, 4  ;;  %s64_s13 = int_to_ptr.hbm [resolvable:$true] %s63_s13 }
   0x8   :  { %31 = dma.hbm_to_vmem [thread:$0]  %s24_s24, 256, %s26_s28, [#allocation3], %s2127_s29, %s2127_s29, %s2128_s3  }
   0x9   :  { %s2129_s0 = smov [#allocation7]  }
   0xa   :  { %s65_s14 = sshll.u32 %s2129_s0, 4  ;;  %s66_s14 = int_to_ptr.vmem [resolvable:$true] %s65_s14 }
   0xb   :  { %71 = dma.hbm_to_vmem [thread:$0]  %s64_s13, 32, %s66_s14, [#allocation6], %s2124_s25, %s2124_s25, %s2125_s26  }
   0xc   :  { %2117 = dma.done.wait [#allocation3], 256  }
   0xd   :  { %2118 = vsyncadd [#allocation3], 4294967040 }
   0xe   :  { %2119 = dma.done.wait [#allocation6], 64  }
   0xf   :  { %2120 = vsyncadd [#allocation6], 4294967232  ;;  %vm91_vm0 = vcmask 261120   ;;  %v2214_v0 = vld [vmem:[#allocation2] sm:$0xff]  ;;  %v2218_v2 = vld [vmem:[#allocation2 + $0x8] sm:$0xff]  ;;  %v2130_v4 = vmov 32.0  }
  0x10   :  { %v92_v1 = vsel %vm91_vm0, %v2214_v0, 0.0  ;;  %v95_v3 = vsel %vm91_vm0, %v2218_v2, 0.0  ;;  %1931 = vrcp.f32 %v2130_v4  ;;  %v1855_v21 = vld [vmem:[%s2627_s1 + $0x8] sm:$0xff]  ;;  %v1854_v23 = vld [vmem:[%s2627_s1] sm:$0xff]  ;;  %v1919_v42 = vld [vmem:[#allocation5] ss:$0 sm:$0xff] }
  0x11   :  { %93 = vadd.xlane.f32.xlu0 %v92_v1  ;;  %179 = vmatpush.bf16.msra.mxu0 %v1855_v21  ;;  %v1920_v47 = vld [vmem:[%s2630_s4] ss:$0 sm:$0xff]  ;;  %s2131_s20 = smov 104   ;;  %s2132_s21 = smov 120   ;;  %vm207_vm8 = vcmask 64512   ;;  %vm489_vm9 = vcmask 1043456  }
  0x12   :  { %s2133_s22 = smov 112   ;;  %s2134_s23 = smov 96   ;;  %vm679_vm10 = vcmask 130048   ;;  %vm682_vm11 = vcmask 195584  }
  0x13   :  { %s2135_s24 = smov 64   ;;  %s2136_s26 = smov 24  }
  0x14   :  { %s2137_s17 = smov [#allocation8]   ;;  %s1696_s27 = sshll.u32 %s2637_s11, 4  ;;  %s1697_s27 = int_to_ptr.hbm [resolvable:$true] %s1696_s27 }
  0x15   :  { %180 = vmatpush.bf16.msra.mxu0 %v1854_v23  ;;  %s1694_s18 = sshll.u32 %s2137_s17, 4  ;;  %s1695_s18 = int_to_ptr.vmem [resolvable:$true] %s1694_s18 }
  0x16   :  { %v1932_v5 = vpop.eup %1931 }
  0x17   :  { %v99_v6 = vmul.f32 32.0, %v1932_v5  ;;  %vm103_vm1 = vweird.f32 %v1932_v5 }
  0x19   :  { %96 = vadd.xlane.f32.xlu0 %v95_v3  ;;  %v100_v7 = vsub.f32 1.0, %v99_v6 }
  0x1b   :  { %v101_v8 = vmul.f32 %v1932_v5, %v100_v7 }
  0x1d   :  { %v102_v9 = vadd.f32 %v1932_v5, %v101_v8 }
  0x1f   :  { %v2222_v10 = vsel %vm103_vm1, %v1932_v5, %v102_v9 }
  0x84   :  { %v94_v11 = vpop.xlane.xlu0 %93 }
  0x85   :  { %v105_v12 = vmul.f32 %v2222_v10, %v94_v11 }
  0x87   :  { %v107_v13 = vsub.f32 %v2214_v0, %v105_v12 }
  0x89   :  { %v109_v14 = vmul.f32 %v107_v13, %v107_v13 }
  0x8b   :  { %v111_v15 = vsel %vm91_vm0, %v109_v14, 0.0 }
  0x8c   :  { %112 = vadd.xlane.f32.xlu1 %v111_v15  ;;  %v97_v16 = vpop.xlane.xlu0 %96 }
  0x8d   :  { %v106_v17 = vmul.f32 %v2222_v10, %v97_v16 }
  0x8f   :  { %v108_v18 = vsub.f32 %v2218_v2, %v106_v17 }
  0x91   :  { %v110_v19 = vmul.f32 %v108_v18, %v108_v18 }
  0x93   :  { %v114_v20 = vsel %vm91_vm0, %v110_v19, 0.0 }
  0x94   :  { %115 = vadd.xlane.f32.xlu1 %v114_v20 }
  0xff   :  { %v113_v22 = vpop.xlane.xlu1 %112 }
 0x100   :  { %v117_v24 = vmul.f32 %v113_v22, %v2222_v10 }
 0x102   :  { %v119_v25 = vadd.f32 1e-05, %v117_v24 }
 0x104   :  { %1933 = vrsqrt.f32 %v119_v25  ;;  %vm127_vm3 = vweird.f32 %v119_v25 }
 0x107   :  { %v116_v26 = vpop.xlane.xlu1 %115 }
 0x108   :  { %v118_v27 = vmul.f32 %v116_v26, %v2222_v10 }
 0x10a   :  { %v1934_v28 = vpop.eup %1933  ;;  %v120_v29 = vadd.f32 1e-05, %v118_v27 }
 0x10b   :  { %v122_v30 = vmul.f32 %v1934_v28, %v119_v25  ;;  %vm128_vm2 = vweird.f32 %v1934_v28 }
 0x10c   :  { %1935 = vrsqrt.f32 %v120_v29  ;;  %vm129_vm4 = vmor %vm127_vm3, %vm128_vm2  ;;  %vm137_vm6 = vweird.f32 %v120_v29  ;;  %vm870_vm3 = vcmask 523264  }
 0x10d   :  { %v123_v31 = vmul.f32 %v1934_v28, %v122_v30 }
 0x10f   :  { %v124_v32 = vmul.f32 0.5, %v123_v31 }
 0x111   :  { %v125_v33 = vsub.f32 1.5, %v124_v32 }
 0x112   :  { %v1936_v34 = vpop.eup %1935 }
 0x113   :  { %v126_v35 = vmul.f32 %v1934_v28, %v125_v33  ;;  %v132_v36 = vmul.f32 %v1936_v34, %v120_v29  ;;  %vm138_vm5 = vweird.f32 %v1936_v34 }
 0x114   :  { %vm139_vm7 = vmor %vm137_vm6, %vm138_vm5 }
 0x115   :  { %v133_v37 = vmul.f32 %v1936_v34, %v132_v36  ;;  %v130_v38 = vsel %vm129_vm4, %v1934_v28, %v126_v35 }
 0x116   :  { %v141_v41 = vmul.f32 %v130_v38, %v107_v13 }
 0x117   :  { %v134_v39 = vmul.f32 0.5, %v133_v37 }
 0x118   :  { %v146_v46 = vmul.f32 %v1919_v42, %v141_v41 }
 0x119   :  { %v135_v40 = vsub.f32 1.5, %v134_v39 }
 0x11a   :  { %v151_v49 = vadd.f32 %v1920_v47, %v146_v46 }
 0x11b   :  { %v136_v43 = vmul.f32 %v1936_v34, %v135_v40 }
 0x11d   :  { %v140_v44 = vsel %vm139_vm7, %v1936_v34, %v136_v43 }
 0x11e   :  { %v142_v45 = vmul.f32 %v140_v44, %v108_v18 }
 0x120   :  { %v147_v48 = vmul.f32 %v1919_v42, %v142_v45 }
 0x122   :  { %v152_v50 = vadd.f32 %v1920_v47, %v147_v48 }
 0x124   :  { %v153_v51 = vpack.c.bf16 %v152_v50, %v151_v49 }
 0x126   :  { %1718 = vmatmul.msk.bf16.vlgmr.msra.gmra.mxu0 %vm91_vm0, %v153_v51 }
 0x1a3   :  { %v182_v52 = vpop.f32.mrf.mxu0 }
 0x1a4   :  { %v187_v53 = vpack.c.bf16 %v182_v52, %v182_v52 }
 0x1a6   :  { %199 = vrot.lane.b32.xlu1 %v187_v53, %s2131_s20  ;;  %191 = vrot.lane.b32.xlu2 %v187_v53, %s2132_s21  ;;  %v203_v58 = vunpack.c.l.b16 %v187_v53 }
 0x1a8   :  { %v204_v59 = vpack.c.b16 %v203_v58, %v203_v58 }
 0x1ab   :  { %v184_v54 = vpop.f32.mrf.mxu0 }
 0x1ac   :  { %v188_v55 = vpack.c.bf16 %v184_v54, %v184_v54 }
 0x1ae   :  { %197 = vrot.lane.b32.xlu0 %v188_v55, %s2133_s22  ;;  %193 = vrot.lane.b32.xlu2 %v188_v55, %s2132_s21  ;;  %v227_v56 = vunpack.c.l.b16 %v188_v55 }
 0x1b0   :  { %v228_v57 = vpack.c.b16 %v227_v56, %v227_v56 }
 0x1b6   :  { %195 = vrot.lane.b32.xlu2 %v187_v53, %s2133_s22 }
 0x1be   :  { %201 = vrot.lane.b32.xlu2 %v188_v55, %s2131_s20 }
 0x1c6   :  { %229 = vrot.lane.b32.xlu2 %v228_v57, %s2134_s23 }
 0x1ce   :  { %205 = vrot.lane.b32.xlu2 %v204_v59, %s2134_s23 }
 0x200   :  { %v192_v60 = vpop.permute.xlu2 %191 }
 0x201   :  { %v250_v61 = vunpack.c.l.b16 %v192_v60 }
 0x203   :  { %v251_v62 = vpack.c.b16 %v250_v61, %v250_v61 }
 0x205   :  { %252 = vrot.lane.b32.xlu0 %v251_v62, %s2134_s23 }
 0x208   :  { %v194_v63 = vpop.permute.xlu2 %193 }
 0x209   :  { %v273_v1 = vunpack.c.l.b16 %v194_v63 }
 0x20b   :  { %v2251_v3 = vpack.c.b16 %v273_v1, %v273_v1 }
 0x20d   :  { %275 = vrot.lane.b32.xlu1 %v2251_v3, %s2134_s23 }
 0x210   :  { %v196_v4 = vpop.permute.xlu2 %195 }
 0x211   :  { %v296_v5 = vunpack.c.l.b16 %v196_v4 }
 0x213   :  { %v2255_v6 = vpack.c.b16 %v296_v5, %v296_v5 }
 0x215   :  { %298 = vrot.lane.b32.xlu1 %v2255_v6, %s2134_s23 }
 0x218   :  { %v200_v7 = vpop.permute.xlu1 %199  ;;  %v202_v8 = vpop.permute.xlu2 %201 }
 0x219   :  { %v342_v9 = vunpack.c.l.b16 %v200_v7  ;;  %v365_v17 = vunpack.c.l.b16 %v202_v8 }
 0x21b   :  { %v2259_v11 = vpack.c.b16 %v342_v9, %v342_v9  ;;  %v2272_v20 = vpack.c.b16 %v365_v17, %v365_v17 }
 0x21d   :  { %527 = vrot.lane.b32.xlu1 %v251_v62, %s2135_s24  ;;  %344 = vrot.lane.b32.xlu2 %v2259_v11, %s2134_s23 }
 0x220   :  { %v198_v12 = vpop.permute.xlu0 %197  ;;  %v230_v13 = vpop.permute.xlu2 %229 }
 0x221   :  { %v319_v14 = vunpack.c.l.b16 %v198_v12  ;;  %v235_v15 = vsel %vm207_vm8, %v230_v13, 0 }
 0x222   :  { %244 = vmatpush.bf16.xpose.msra.mxu2 %v235_v15 }
 0x223   :  { %v2265_v16 = vpack.c.b16 %v319_v14, %v319_v14 }
 0x225   :  { %321 = vrot.lane.b32.xlu0 %v2265_v16, %s2134_s23  ;;  %506 = vrot.lane.b32.xlu2 %v228_v57, %s2135_s24 }
 0x228   :  { %v206_v18 = vpop.permute.xlu2 %205 }
 0x229   :  { %1720 = vmatmul.msk.bf16.vlgmr.msra.gmra.mxu2 %vm207_vm8, %v188_v55  ;;  %v212_v19 = vsel %vm207_vm8, %v206_v18, 0 }
 0x22a   :  { %221 = vmatpush.bf16.xpose.msra.mxu1 %v212_v19 }
 0x22d   :  { %367 = vrot.lane.b32.xlu0 %v2272_v20, %s2134_s23 }
 0x231   :  { %1719 = vmatmul.msk.bf16.vlgmr.msra.gmra.mxu1 %vm207_vm8, %v187_v53 }
 0x235   :  { %484 = vrot.lane.b32.xlu0 %v204_v59, %s2135_s24 }
 0x277   :  { %v253_v21 = vpop.permute.xlu0 %252  ;;  %v345_v22 = vpop.permute.xlu2 %344 }
 0x278   :  { %v258_v23 = vsel %vm207_vm8, %v253_v21, 0  ;;  %v350_v24 = vsel %vm207_vm8, %v345_v22, 0 }
 0x279   :  { %267 = vmatpush.bf16.xpose.msra.mxu3 %v258_v23 }
 0x27f   :  { %v276_v25 = vpop.permute.xlu1 %275  ;;  %v507_v31 = vpop.permute.xlu2 %506 }
 0x280   :  { %1721 = vmatmul.msk.bf16.vlgmr.msra.gmra.mxu3 %vm207_vm8, %v192_v60  ;;  %v281_v26 = vsel %vm207_vm8, %v276_v25, 0  ;;  %v512_v34 = vsel %vm489_vm9, %v507_v31, 0 }
 0x281   :  { %359 = vmatpush.bf16.xpose.msrb.mxu3 %v350_v24  ;;  %290 = vmatpush.bf16.xpose.msrb.mxu0 %v281_v26 }
 0x287   :  { %v299_v27 = vpop.permute.xlu1 %298 }
 0x288   :  { %1722 = vmatmul.msk.bf16.vlgmr.msrb.gmra.mxu0 %vm207_vm8, %v194_v63  ;;  %v304_v28 = vsel %vm207_vm8, %v299_v27, 0 }
 0x289   :  { %313 = vmatpush.bf16.xpose.msrb.mxu1 %v304_v28 }
 0x28f   :  { %v528_v29 = vpop.permute.xlu1 %527 }
 0x290   :  { %v533_v30 = vsel %vm489_vm9, %v528_v29, 0  ;;  %1723 = vmatmul.msk.bf16.vlgmr.msrb.gmra.mxu1 %vm207_vm8, %v196_v4  ;;  %1725 = vmatmul.msk.bf16.vlgmr.msrb.gmra.mxu3 %vm207_vm8, %v200_v7 }
 0x291   :  { %542 = vmatpush.bf16.msra.mxu3 %v533_v30 }
 0x297   :  { %v322_v32 = vpop.permute.xlu0 %321 }
 0x298   :  { %v327_v33 = vsel %vm207_vm8, %v322_v32, 0 }
 0x299   :  { %336 = vmatpush.bf16.xpose.msrb.mxu2 %v327_v33 }
 0x29f   :  { %v368_v35 = vpop.permute.xlu0 %367 }
 0x2a0   :  { %v373_v36 = vsel %vm207_vm8, %v368_v35, 0  ;;  %1724 = vmatmul.msk.bf16.vlgmr.msrb.gmra.mxu2 %vm207_vm8, %v198_v12 }
 0x2a1   :  { %521 = vmatpush.bf16.msra.mxu2 %v512_v34  ;;  %382 = vmatpush.bf16.xpose.msra.mxu0 %v373_v36 }
 0x2a7   :  { %v485_v37 = vpop.permute.xlu0 %484 }
 0x2a8   :  { %v491_v38 = vsel %vm489_vm9, %v485_v37, 0  ;;  %1726 = vmatmul.msk.bf16.vlgmr.msra.gmra.mxu0 %vm207_vm8, %v202_v8 }
 0x2a9   :  { %500 = vmatpush.bf16.msra.mxu1 %v491_v38 }
 0x2ac   :  { %v246_v39 = vpop.f32.mrf.mxu2 }
 0x2ad   :  { %v391_v40 = vsel %vm207_vm8, %v246_v39, -inf }
 0x2ae   :  { %392 = vmax.xlane.f32.xlu2 %v391_v40  ;;  %v223_v41 = vpop.f32.mrf.mxu1 }
 0x2af   :  { %v388_v42 = vsel %vm207_vm8, %v223_v41, -inf }
 0x2b0   :  { %389 = vmax.xlane.f32.xlu0 %v388_v42 }
 0x2b4   :  { %v248_v43 = vpop.f32.mrf.mxu2 }
 0x2b6   :  { %v225_v44 = vpop.f32.mrf.mxu1 }
 0x303   :  { %v269_v45 = vpop.f32.mrf.mxu3 }
 0x304   :  { %v394_v46 = vsel %vm207_vm8, %v269_v45, -inf }
 0x305   :  { %v292_v47 = vpop.f32.mrf.mxu0  ;;  %395 = vmax.xlane.f32.xlu1 %v394_v46 }
 0x306   :  { %v397_v55 = vsel %vm207_vm8, %v292_v47, -inf }
 0x30b   :  { %v271_v48 = vpop.f32.mrf.mxu3 }
 0x30d   :  { %v294_v49 = vpop.f32.mrf.mxu0  ;;  %v315_v50 = vpop.f32.mrf.mxu1 }
 0x30e   :  { %v400_v51 = vsel %vm207_vm8, %v315_v50, -inf }
 0x30f   :  { %401 = vmax.xlane.f32.xlu2 %v400_v51 }
 0x313   :  { %v361_v52 = vpop.f32.mrf.mxu3 }
 0x314   :  { %v406_v53 = vsel %vm207_vm8, %v361_v52, -inf }
 0x315   :  { %v317_v54 = vpop.f32.mrf.mxu1  ;;  %407 = vmax.xlane.f32.xlu0 %v406_v53 }
 0x317   :  { %398 = vmax.xlane.f32.xlu2 %v397_v55 }
 0x31b   :  { %v363_v56 = vpop.f32.mrf.mxu3 }
 0x321   :  { %v393_v57 = vpop.xlane.xlu2 %392 }
 0x322   :  { %v413_v58 = vsub.f32 %v246_v39, %v393_v57 }
 0x323   :  { %v2299_v59 = vpop.f32.mrf.mxu2  ;;  %v390_v60 = vpop.xlane.xlu0 %389 }
 0x324   :  { %v422_v61 = vmul.f32 1.442695, %v413_v58  ;;  %v412_v62 = vsub.f32 %v223_v41, %v390_v60  ;;  %v403_v13 = vsel %vm207_vm8, %v2299_v59, -inf }
 0x325   :  { %v2301_v63 = vpop.f32.mrf.mxu0 }
 0x326   :  { %1937 = vpow2.f32 %v422_v61  ;;  %v420_v1 = vmul.f32 1.442695, %v412_v62  ;;  %v409_v14 = vsel %vm207_vm8, %v2301_v63, -inf }
 0x328   :  { %1939 = vpow2.f32 %v420_v1 }
 0x32b   :  { %v340_v4 = vpop.f32.mrf.mxu2 }
 0x32c   :  { %v1938_v5 = vpop.eup %1937 }
 0x32d   :  { %v386_v7 = vpop.f32.mrf.mxu0  ;;  %v439_v8 = vsel %vm207_vm8, %v1938_v5, 0.0 }
 0x32e   :  { %v1940_v9 = vpop.eup %1939  ;;  %440 = vadd.xlane.f32.xlu0 %v439_v8 }
 0x32f   :  { %548 = vrot.lane.b32.xlu2 %v2251_v3, %s2135_s24  ;;  %v436_v12 = vsel %vm207_vm8, %v1940_v9, 0.0 }
 0x330   :  { %437 = vadd.xlane.f32.xlu1 %v436_v12 }
 0x338   :  { %404 = vmax.xlane.f32.xlu1 %v403_v13 }
 0x340   :  { %410 = vmax.xlane.f32.xlu1 %v409_v14 }
 0x359   :  { %590 = vrot.lane.b32.xlu1 %v2265_v16, %s2135_s24 }
 0x378   :  { %v396_v15 = vpop.xlane.xlu1 %395 }
 0x379   :  { %v414_v19 = vsub.f32 %v269_v45, %v396_v15 }
 0x37b   :  { %v424_v3 = vmul.f32 1.442695, %v414_v19 }
 0x382   :  { %v402_v17 = vpop.xlane.xlu2 %401 }
 0x383   :  { %v416_v18 = vsub.f32 %v315_v50, %v402_v17 }
 0x385   :  { %v428_v21 = vmul.f32 1.442695, %v416_v18 }
 0x387   :  { %1941 = vpow2.f32 %v428_v21 }
 0x388   :  { %v408_v22 = vpop.xlane.xlu0 %407  ;;  %1943 = vpow2.f32 %v424_v3 }
 0x389   :  { %v418_v23 = vsub.f32 %v361_v52, %v408_v22 }
 0x38a   :  { %v399_v24 = vpop.xlane.xlu2 %398 }
 0x38b   :  { %v432_v25 = vmul.f32 1.442695, %v418_v23  ;;  %v415_v26 = vsub.f32 %v292_v47, %v399_v24 }
 0x38d   :  { %v2313_v27 = vpop.eup %1941  ;;  %1945 = vpow2.f32 %v432_v25  ;;  %v426_v28 = vmul.f32 1.442695, %v415_v26 }
 0x38e   :  { %v448_v16 = vsel %vm207_vm8, %v2313_v27, 0.0  ;;  %v1944_v29 = vpop.eup %1943 }
 0x38f   :  { %1947 = vpow2.f32 %v426_v28  ;;  %449 = vadd.xlane.f32.xlu2 %v448_v16  ;;  %v442_v35 = vsel %vm207_vm8, %v1944_v29, 0.0 }
 0x392   :  { %v549_v30 = vpop.permute.xlu2 %548 }
 0x393   :  { %v1946_v31 = vpop.eup %1945  ;;  %v554_v32 = vsel %vm489_vm9, %v549_v30, 0 }
 0x394   :  { %563 = vmatpush.bf16.msrb.mxu0 %v554_v32  ;;  %v454_v33 = vsel %vm207_vm8, %v1946_v31, 0.0 }
 0x395   :  { %v1948_v34 = vpop.eup %1947  ;;  %455 = vadd.xlane.f32.xlu1 %v454_v33 }
 0x396   :  { %v445_v36 = vsel %vm207_vm8, %v1948_v34, 0.0 }
 0x397   :  { %443 = vadd.xlane.f32.xlu2 %v442_v35  ;;  %446 = vadd.xlane.f32.xlu0 %v445_v36 }
 0x3a1   :  { %v441_v37 = vpop.xlane.xlu0 %440 }
 0x3a2   :  { %1949 = vrcp.f32 %v441_v37 }
 0x3a3   :  { %v438_v38 = vpop.xlane.xlu1 %437 }
 0x3a4   :  { %1951 = vrcp.f32 %v438_v38 }
 0x3a8   :  { %v1950_v39 = vpop.eup %1949 }
 0x3a9   :  { %v469_v40 = vmul.f32 %v1950_v39, %v1938_v5 }
 0x3aa   :  { %v1952_v41 = vpop.eup %1951 }
 0x3ab   :  { %v477_v42 = vpack.c.bf16 %v469_v40, %v469_v40  ;;  %v468_v43 = vmul.f32 %v1952_v41, %v1940_v9  ;;  %v405_v44 = vpop.xlane.xlu1 %404 }
 0x3ac   :  { %v417_v45 = vsub.f32 %v2299_v59, %v405_v44 }
 0x3ad   :  { %v476_v46 = vpack.c.bf16 %v468_v43, %v468_v43  ;;  %1728 = vmatmul.msk.bf16.vlgmr.msra.gmra.mxu2 %vm207_vm8, %v477_v42 }
 0x3ae   :  { %v430_v47 = vmul.f32 1.442695, %v417_v45  ;;  %632 = vrot.lane.b32.xlu1 %v2272_v20, %s2135_s24  ;;  %v1857_v45 = vld [vmem:[%s2628_s2 + $0x8] sm:$0xff] }
 0x3af   :  { %1727 = vmatmul.msk.bf16.vlgmr.msra.gmra.mxu1 %vm207_vm8, %v476_v46  ;;  %611 = vrot.lane.b32.xlu2 %v2259_v11, %s2135_s24  ;;  %v1856_v46 = vld [vmem:[%s2628_s2] sm:$0xff] }
 0x3b0   :  { %1953 = vpow2.f32 %v430_v47 }
 0x3b3   :  { %v411_v48 = vpop.xlane.xlu1 %410 }
 0x3b4   :  { %v419_v49 = vsub.f32 %v2301_v63, %v411_v48 }
 0x3b6   :  { %v1954_v50 = vpop.eup %1953  ;;  %v434_v51 = vmul.f32 1.442695, %v419_v49 }
 0x3b7   :  { %v451_v52 = vsel %vm207_vm8, %v1954_v50, 0.0 }
 0x3b8   :  { %1955 = vpow2.f32 %v434_v51  ;;  %452 = vadd.xlane.f32.xlu0 %v451_v52 }
 0x3be   :  { %v1956_v53 = vpop.eup %1955 }
 0x3bf   :  { %v457_v54 = vsel %vm207_vm8, %v1956_v53, 0.0 }
 0x3c0   :  { %458 = vadd.xlane.f32.xlu0 %v457_v54 }
 0x3cb   :  { %v591_v20 = vpop.permute.xlu1 %590 }
 0x3cc   :  { %v596_v55 = vsel %vm489_vm9, %v591_v20, 0 }
 0x3cd   :  { %605 = vmatpush.bf16.msrb.mxu2 %v596_v55 }
 0x3d4   :  { %569 = vrot.lane.b32.xlu0 %v2255_v6, %s2135_s24 }
 0x402   :  { %v450_v11 = vpop.xlane.xlu2 %449 }
 0x408   :  { %v456_v4 = vpop.xlane.xlu1 %455 }
 0x40a   :  { %v447_v56 = vpop.xlane.xlu0 %446  ;;  %v444_v57 = vpop.xlane.xlu2 %443 }
 0x40b   :  { %1957 = vrcp.f32 %v447_v56 }
 0x40c   :  { %1959 = vrcp.f32 %v444_v57 }
 0x40d   :  { %1961 = vrcp.f32 %v456_v4 }
 0x411   :  { %v1958_v58 = vpop.eup %1957 }
 0x412   :  { %v1960_v59 = vpop.eup %1959  ;;  %v471_v60 = vmul.f32 %v1958_v58, %v1948_v34  ;;  %v612_v61 = vpop.permute.xlu2 %611 }
 0x413   :  { %v470_v62 = vmul.f32 %v1960_v59, %v1944_v29  ;;  %v617_v63 = vsel %vm489_vm9, %v612_v61, 0  ;;  %v1962_v6 = vpop.eup %1961 }
 0x414   :  { %v479_v1 = vpack.c.bf16 %v471_v60, %v471_v60  ;;  %626 = vmatpush.bf16.msrb.mxu3 %v617_v63  ;;  %v474_v8 = vmul.f32 %v1962_v6, %v1946_v31 }
 0x415   :  { %v478_v5 = vpack.c.bf16 %v470_v62, %v470_v62 }
 0x416   :  { %1730 = vmatmul.msk.bf16.vlgmr.msrb.gmra.mxu0 %vm207_vm8, %v479_v1  ;;  %v482_v12 = vpack.c.bf16 %v474_v8, %v474_v8 }
 0x417   :  { %1729 = vmatmul.msk.bf16.vlgmr.msra.gmra.mxu3 %vm207_vm8, %v478_v5 }
 0x420   :  { %v633_v7 = vpop.permute.xlu1 %632 }
 0x421   :  { %v638_v9 = vsel %vm489_vm9, %v633_v7, 0 }
 0x422   :  { %647 = vmatpush.bf16.msra.mxu0 %v638_v9 }
 0x427   :  { %1733 = vmatmul.msk.bf16.vlgmr.msrb.gmra.mxu3 %vm207_vm8, %v482_v12 }
 0x42b   :  { %v453_v13 = vpop.xlane.xlu0 %452 }
 0x42c   :  { %1963 = vrcp.f32 %v453_v13  ;;  %v502_v14 = vpop.f32.mrf.mxu1 }
 0x430   :  { %v523_v15 = vpop.f32.mrf.mxu2 }
 0x432   :  { %v1964_v17 = vpop.eup %1963 }
 0x433   :  { %v473_v18 = vmul.f32 %v1964_v17, %v1954_v50  ;;  %v459_v19 = vpop.xlane.xlu0 %458  ;;  %v1859_v17 = vld [vmem:[%s2631_s5 + $0x8] sm:$0xff] }
 0x434   :  { %1965 = vrcp.f32 %v459_v19  ;;  %v504_v21 = vpop.f32.mrf.mxu1  ;;  %807 = vmatpush.bf16.msra.mxu2 %v1859_v17 }
 0x435   :  { %v481_v3 = vpack.c.bf16 %v473_v18, %v473_v18  ;;  %1967 = vrcp.f32 %v450_v11 }
 0x437   :  { %1732 = vmatmul.msk.bf16.vlgmr.msrb.gmra.mxu2 %vm207_vm8, %v481_v3  ;;  %v1858_v3 = vld [vmem:[%s2631_s5] sm:$0xff] }
 0x438   :  { %v525_v22 = vpop.f32.mrf.mxu2  ;;  %808 = vmatpush.bf16.msra.mxu2 %v1858_v3 }
 0x43a   :  { %v1966_v23 = vpop.eup %1965 }
 0x43b   :  { %v475_v24 = vmul.f32 %v1966_v23, %v1956_v53  ;;  %v1968_v26 = vpop.eup %1967 }
 0x43c   :  { %v472_v28 = vmul.f32 %v1968_v26, %v2313_v27 }
 0x43d   :  { %v483_v25 = vpack.c.bf16 %v475_v24, %v475_v24 }
 0x43e   :  { %v480_v30 = vpack.c.bf16 %v472_v28, %v472_v28 }
 0x43f   :  { %1734 = vmatmul.msk.bf16.vlgmr.msra.gmra.mxu0 %vm207_vm8, %v483_v25 }
 0x446   :  { %v570_v16 = vpop.permute.xlu0 %569 }
 0x447   :  { %v575_v29 = vsel %vm489_vm9, %v570_v16, 0 }
 0x448   :  { %584 = vmatpush.bf16.msrb.mxu1 %v575_v29 }
 0x44b   :  { %1731 = vmatmul.msk.bf16.vlgmr.msrb.gmra.mxu1 %vm207_vm8, %v480_v30 }
 0x44c   :  { %711 = vmatpush.bf16.msra.mxu1 %v1857_v45 }
 0x450   :  { %712 = vmatpush.bf16.msra.mxu1 %v1856_v46 }
 0x493   :  { %v565_v31 = vpop.f32.mrf.mxu0 }
 0x49a   :  { %v544_v32 = vpop.f32.mrf.mxu3 }
 0x49b   :  { %v1889_v33 = vpack.i.bf16 %v565_v31, %v544_v32  ;;  %v567_v34 = vpop.f32.mrf.mxu0 }
 0x49d   :  { %1890 = vrot.lane.b32.xlu0 %v1889_v33, %s2128_s3 }
 0x4a2   :  { %v546_v35 = vpop.f32.mrf.mxu3 }
 0x4aa   :  { %v628_v36 = vpop.f32.mrf.mxu3 }
 0x4b2   :  { %v630_v37 = vpop.f32.mrf.mxu3 }
 0x4b3   :  { %v1921_v37 = vld [vmem:[#allocation7] ss:$0 sm:$0xff] }
 0x4ba   :  { %v607_v38 = vpop.f32.mrf.mxu2 }
 0x4bc   :  { %v649_v39 = vpop.f32.mrf.mxu0 }
 0x4bd   :  { %v1899_v40 = vpack.i.bf16 %v649_v39, %v628_v36 }
 0x4bf   :  { %1900 = vrot.lane.b32.xlu1 %v1899_v40, %s2136_s26 }
 0x4c2   :  { %v609_v27 = vpop.f32.mrf.mxu2 }
 0x4c3   :  { %v1922_v27 = vld [vmem:[%s2636_s10] ss:$0 sm:$0xff] }
 0x4c4   :  { %v651_v41 = vpop.f32.mrf.mxu0 }
 0x4c8   :  { %v586_v42 = vpop.f32.mrf.mxu1 }
 0x4c9   :  { %v1894_v43 = vpack.i.bf16 %v607_v38, %v586_v42 }
 0x4cb   :  { %1895 = vrot.lane.b32.xlu2 %v1894_v43, %s2124_s25 }
 0x4d0   :  { %v588_v44 = vpop.f32.mrf.mxu1 }
 0x50f   :  { %v1891_v47 = vpop.permute.xlu0 %1890 }
 0x510   :  { %v1893_v49 = vunpack.i.h.bf16 %v1891_v47  ;;  %v1892_v50 = vunpack.i.l.bf16 %v1891_v47  ;;  %v1863_v47 = vld [vmem:[%s2633_s7 + $0x18] sm:$0xff] }
 0x511   :  { %878 = vmatpush.bf16.msra.mxu3 %v1863_v47 }
 0x512   :  { %v678_v54 = vsel %vm207_vm8, %v523_v15, %v1893_v49  ;;  %v677_v20 = vsel %vm207_vm8, %v502_v14, %v1892_v50  ;;  %v1861_v49 = vld [vmem:[%s2633_s7 + $0x8] sm:$0xff]  ;;  %v1923_v50 = vld [vmem:[%s2632_s6] ss:$0 sm:$0xff] }
 0x525   :  { %v1896_v48 = vpop.permute.xlu2 %1895 }
 0x526   :  { %v1898_v51 = vunpack.i.h.bf16 %v1896_v48  ;;  %v1897_v52 = vunpack.i.l.bf16 %v1896_v48  ;;  %v1862_v48 = vld [vmem:[%s2633_s7 + $0x10] sm:$0xff] }
 0x527   :  { %879 = vmatpush.bf16.msra.mxu3 %v1862_v48 }
 0x528   :  { %v681_v56 = vsel %vm679_vm10, %v678_v54, %v1898_v51  ;;  %v680_v57 = vsel %vm679_vm10, %v677_v20, %v1897_v52  ;;  %v1860_v52 = vld [vmem:[%s2633_s7] sm:$0xff] }
 0x52b   :  { %880 = vmatpush.bf16.msra.mxu3 %v1861_v49 }
 0x52f   :  { %881 = vmatpush.bf16.msra.mxu3 %v1860_v52 }
 0x531   :  { %v1901_v53 = vpop.permute.xlu1 %1900 }
 0x532   :  { %v1903_v55 = vunpack.i.h.bf16 %v1901_v53  ;;  %v1902_v11 = vunpack.i.l.bf16 %v1901_v53 }
 0x534   :  { %v683_v58 = vsel %vm682_vm11, %v680_v57, %v1902_v11  ;;  %v684_v59 = vsel %vm682_vm11, %v681_v56, %v1903_v55 }
 0x535   :  { %v685_v60 = vpack.c.bf16 %v684_v59, %v683_v58 }
 0x537   :  { %1743 = vmatmul.msk.bf16.vlgmr.msra.gmra.mxu1 %vm91_vm0, %v685_v60 }
 0x5b4   :  { %v714_v61 = vpop.f32.mrf.mxu1 }
 0x5b5   :  { %v2361_v62 = vadd.f32 %v714_v61, %v2214_v0 }
 0x5b7   :  { %v723_v63 = vsel %vm91_vm0, %v2361_v62, 0.0 }
 0x5b8   :  { %724 = vadd.xlane.f32.xlu0 %v723_v63 }
 0x5bc   :  { %v716_v1 = vpop.f32.mrf.mxu1 }
 0x5bd   :  { %v2366_v4 = vadd.f32 %v716_v1, %v2218_v2 }
 0x5bf   :  { %v726_v5 = vsel %vm91_vm0, %v2366_v4, 0.0 }
 0x5c0   :  { %727 = vadd.xlane.f32.xlu2 %v726_v5 }
 0x62b   :  { %v725_v6 = vpop.xlane.xlu0 %724 }
 0x62c   :  { %v729_v7 = vmul.f32 %v725_v6, %v2222_v10 }
 0x62e   :  { %v731_v8 = vsub.f32 %v2361_v62, %v729_v7 }
 0x630   :  { %v733_v9 = vmul.f32 %v731_v8, %v731_v8 }
 0x632   :  { %v735_v0 = vsel %vm91_vm0, %v733_v9, 0.0 }
 0x633   :  { %736 = vadd.xlane.f32.xlu1 %v735_v0  ;;  %v728_v12 = vpop.xlane.xlu2 %727 }
 0x634   :  { %v730_v13 = vmul.f32 %v728_v12, %v2222_v10 }
 0x636   :  { %v732_v14 = vsub.f32 %v2366_v4, %v730_v13 }
 0x638   :  { %v734_v2 = vmul.f32 %v732_v14, %v732_v14 }
 0x63a   :  { %v738_v15 = vsel %vm91_vm0, %v734_v2, 0.0  ;;  %v1924_v2 = vld [vmem:[%s2634_s8] ss:$0 sm:$0xff] }
 0x63b   :  { %739 = vadd.xlane.f32.xlu0 %v738_v15 }
 0x6a6   :  { %v737_v18 = vpop.xlane.xlu1 %736 }
 0x6a7   :  { %v741_v19 = vmul.f32 %v737_v18, %v2222_v10 }
 0x6a9   :  { %v743_v21 = vadd.f32 1e-05, %v741_v19 }
 0x6ab   :  { %1969 = vrsqrt.f32 %v743_v21  ;;  %vm751_vm13 = vweird.f32 %v743_v21 }
 0x6ae   :  { %v740_v22 = vpop.xlane.xlu0 %739 }
 0x6af   :  { %v742_v23 = vmul.f32 %v740_v22, %v2222_v10 }
 0x6b1   :  { %v1970_v24 = vpop.eup %1969  ;;  %v744_v25 = vadd.f32 1e-05, %v742_v23 }
 0x6b2   :  { %v746_v26 = vmul.f32 %v1970_v24, %v743_v21  ;;  %vm752_vm12 = vweird.f32 %v1970_v24 }
 0x6b3   :  { %1971 = vrsqrt.f32 %v744_v25  ;;  %vm753_vm14 = vmor %vm751_vm13, %vm752_vm12  ;;  %vm761_vm1 = vweird.f32 %v744_v25 }
 0x6b4   :  { %v747_v28 = vmul.f32 %v1970_v24, %v746_v26 }
 0x6b6   :  { %v748_v16 = vmul.f32 0.5, %v747_v28 }
 0x6b8   :  { %v749_v29 = vsub.f32 1.5, %v748_v16 }
 0x6b9   :  { %v1972_v30 = vpop.eup %1971 }
 0x6ba   :  { %v750_v31 = vmul.f32 %v1970_v24, %v749_v29  ;;  %v756_v32 = vmul.f32 %v1972_v30, %v744_v25  ;;  %vm762_vm15 = vweird.f32 %v1972_v30 }
 0x6bb   :  { %vm763_vm2 = vmor %vm761_vm1, %vm762_vm15 }
 0x6bc   :  { %v757_v33 = vmul.f32 %v1972_v30, %v756_v32  ;;  %v754_v34 = vsel %vm753_vm14, %v1970_v24, %v750_v31  ;;  %v1865_v32 = vld [vmem:[%s2627_s1 + $0x18] sm:$0xff] }
 0x6bd   :  { %v765_v38 = vmul.f32 %v754_v34, %v731_v8  ;;  %975 = vmatpush.bf16.msrb.mxu0 %v1865_v32 }
 0x6be   :  { %v758_v35 = vmul.f32 0.5, %v757_v33 }
 0x6bf   :  { %v770_v41 = vmul.f32 %v1921_v37, %v765_v38 }
 0x6c0   :  { %v759_v36 = vsub.f32 1.5, %v758_v35 }
 0x6c1   :  { %v775_v44 = vadd.f32 %v1922_v27, %v770_v41 }
 0x6c2   :  { %v760_v39 = vmul.f32 %v1972_v30, %v759_v36  ;;  %v1864_v36 = vld [vmem:[%s2627_s1 + $0x10] sm:$0xff] }
 0x6c3   :  { %976 = vmatpush.bf16.msrb.mxu0 %v1864_v36 }
 0x6c4   :  { %v764_v40 = vsel %vm763_vm2, %v1972_v30, %v760_v39 }
 0x6c5   :  { %v766_v42 = vmul.f32 %v764_v40, %v732_v14 }
 0x6c7   :  { %v771_v43 = vmul.f32 %v1921_v37, %v766_v42 }
 0x6c9   :  { %v776_v45 = vadd.f32 %v1922_v27, %v771_v43 }
 0x6cb   :  { %v777_v46 = vpack.c.bf16 %v776_v45, %v775_v44 }
 0x6cd   :  { %1752 = vmatmul.msk.bf16.vlgmr.msra.gmra.mxu2 %vm91_vm0, %v777_v46 }
 0x750   :  { %v810_v51 = vpop.f32.mrf.mxu2 }
 0x751   :  { %v811_v53 = vadd.f32 %v1923_v50, %v810_v51  ;;  %v1925_v51 = vld [vmem:[#allocation5 + $0x1] ss:$0 sm:$0xff] }
 0x753   :  { %v815_v54 = vmul.f32 %v811_v53, %v811_v53 }
 0x755   :  { %v817_v20 = vmul.f32 %v815_v54, %v811_v53 }
 0x757   :  { %v819_v55 = vmul.f32 0.044715, %v817_v20  ;;  %v1926_v20 = vld [vmem:[%s2630_s4 + $0x1] ss:$0 sm:$0xff] }
 0x758   :  { %v812_v11 = vpop.f32.mrf.mxu2 }
 0x759   :  { %v821_v56 = vadd.f32 %v819_v55, %v811_v53  ;;  %v813_v57 = vadd.f32 %v1923_v50, %v812_v11 }
 0x75b   :  { %v823_v58 = vmul.f32 0.7978846, %v821_v56  ;;  %v816_v59 = vmul.f32 %v813_v57, %v813_v57 }
 0x75d   :  { %v818_v60 = vmul.f32 %v816_v59, %v813_v57  ;;  %1973 = vtanh.f32 %v823_v58 }
 0x75f   :  { %v820_v61 = vmul.f32 0.044715, %v818_v60 }
 0x761   :  { %v822_v63 = vadd.f32 %v820_v61, %v813_v57 }
 0x763   :  { %v824_v1 = vmul.f32 0.7978846, %v822_v63  ;;  %v1974_v5 = vpop.eup %1973 }
 0x764   :  { %v827_v6 = vadd.f32 1.0, %v1974_v5 }
 0x765   :  { %1975 = vtanh.f32 %v824_v1 }
 0x766   :  { %v829_v8 = vmul.f32 0.5, %v827_v6 }
 0x768   :  { %v831_v12 = vmul.f32 %v829_v8, %v811_v53 }
 0x76b   :  { %v1976_v7 = vpop.eup %1975 }
 0x76c   :  { %v828_v9 = vadd.f32 1.0, %v1976_v7 }
 0x76e   :  { %v830_v0 = vmul.f32 0.5, %v828_v9 }
 0x770   :  { %v832_v13 = vmul.f32 %v830_v0, %v813_v57 }
 0x772   :  { %v833_v14 = vpack.c.bf16 %v832_v13, %v831_v12 }
 0x774   :  { %1769 = vmatmul.msk.bf16.vlgmr.msra.gmra.mxu3 %vm870_vm3, %v833_v14 }
 0x7f7   :  { %v883_v15 = vpop.f32.mrf.mxu3 }
 0x7f8   :  { %v884_v17 = vadd.f32 %v1924_v2, %v883_v15 }
 0x7fa   :  { %v2408_v18 = vadd.f32 %v884_v17, %v2361_v62 }
 0x7fc   :  { %v894_v19 = vsel %vm91_vm0, %v2408_v18, 0.0 }
 0x7fd   :  { %895 = vadd.xlane.f32.xlu2 %v894_v19 }
 0x7ff   :  { %v885_v21 = vpop.f32.mrf.mxu3 }
 0x800   :  { %v886_v3 = vadd.f32 %v1924_v2, %v885_v21 }
 0x802   :  { %v2413_v22 = vadd.f32 %v886_v3, %v2366_v4 }
 0x804   :  { %v897_v23 = vsel %vm91_vm0, %v2413_v22, 0.0 }
 0x805   :  { %898 = vadd.xlane.f32.xlu1 %v897_v23 }
 0x870   :  { %v896_v24 = vpop.xlane.xlu2 %895 }
 0x871   :  { %v900_v25 = vmul.f32 %v896_v24, %v2222_v10 }
 0x873   :  { %v902_v26 = vsub.f32 %v2408_v18, %v900_v25 }
 0x875   :  { %v904_v62 = vmul.f32 %v902_v26, %v902_v26 }
 0x877   :  { %v906_v28 = vsel %vm91_vm0, %v904_v62, 0.0 }
 0x878   :  { %v899_v16 = vpop.xlane.xlu1 %898  ;;  %907 = vadd.xlane.f32.xlu0 %v906_v28 }
 0x879   :  { %v901_v29 = vmul.f32 %v899_v16, %v2222_v10 }
 0x87b   :  { %v903_v30 = vsub.f32 %v2413_v22, %v901_v29 }
 0x87d   :  { %v905_v4 = vmul.f32 %v903_v30, %v903_v30 }
 0x87f   :  { %v909_v31 = vsel %vm91_vm0, %v905_v4, 0.0 }
 0x880   :  { %910 = vadd.xlane.f32.xlu2 %v909_v31 }
 0x8eb   :  { %v908_v33 = vpop.xlane.xlu0 %907 }
 0x8ec   :  { %v912_v34 = vmul.f32 %v908_v33, %v2222_v10 }
 0x8ee   :  { %v914_v35 = vadd.f32 1e-05, %v912_v34 }
 0x8f0   :  { %1977 = vrsqrt.f32 %v914_v35  ;;  %vm922_vm5 = vweird.f32 %v914_v35 }
 0x8f3   :  { %v911_v37 = vpop.xlane.xlu2 %910 }
 0x8f4   :  { %v913_v38 = vmul.f32 %v911_v37, %v2222_v10 }
 0x8f6   :  { %v1978_v39 = vpop.eup %1977  ;;  %v915_v40 = vadd.f32 1e-05, %v913_v38 }
 0x8f7   :  { %v917_v27 = vmul.f32 %v1978_v39, %v914_v35  ;;  %vm923_vm4 = vweird.f32 %v1978_v39 }
 0x8f8   :  { %1979 = vrsqrt.f32 %v915_v40  ;;  %vm924_vm6 = vmor %vm922_vm5, %vm923_vm4  ;;  %vm932_vm12 = vweird.f32 %v915_v40 }
 0x8f9   :  { %v918_v41 = vmul.f32 %v1978_v39, %v917_v27 }
 0x8fb   :  { %v919_v42 = vmul.f32 0.5, %v918_v41 }
 0x8fd   :  { %v920_v43 = vsub.f32 1.5, %v919_v42 }
 0x8fe   :  { %v1980_v44 = vpop.eup %1979 }
 0x8ff   :  { %v921_v45 = vmul.f32 %v1978_v39, %v920_v43  ;;  %v927_v46 = vmul.f32 %v1980_v44, %v915_v40  ;;  %vm933_vm7 = vweird.f32 %v1980_v44 }
 0x900   :  { %vm934_vm13 = vmor %vm932_vm12, %vm933_vm7 }
 0x901   :  { %v928_v47 = vmul.f32 %v1980_v44, %v927_v46  ;;  %v925_v48 = vsel %vm924_vm6, %v1978_v39, %v921_v45 }
 0x902   :  { %v936_v52 = vmul.f32 %v925_v48, %v902_v26 }
 0x903   :  { %v929_v49 = vmul.f32 0.5, %v928_v47 }
 0x904   :  { %v941_v55 = vmul.f32 %v1925_v51, %v936_v52 }
 0x905   :  { %v930_v50 = vsub.f32 1.5, %v929_v49 }
 0x906   :  { %v946_v57 = vadd.f32 %v1926_v20, %v941_v55 }
 0x907   :  { %v931_v53 = vmul.f32 %v1980_v44, %v930_v50 }
 0x909   :  { %v935_v54 = vsel %vm934_vm13, %v1980_v44, %v931_v53 }
 0x90a   :  { %v937_v11 = vmul.f32 %v935_v54, %v903_v30 }
 0x90c   :  { %v942_v56 = vmul.f32 %v1925_v51, %v937_v11 }
 0x90e   :  { %v947_v58 = vadd.f32 %v1926_v20, %v942_v56 }
 0x910   :  { %v948_v59 = vpack.c.bf16 %v947_v58, %v946_v57 }
 0x912   :  { %1783 = vmatmul.msk.bf16.vlgmr.msrb.gmra.mxu0 %vm91_vm0, %v948_v59 }
 0x98f   :  { %v978_v60 = vpop.f32.mrf.mxu0 }
 0x990   :  { %v983_v61 = vpack.c.bf16 %v978_v60, %v978_v60 }
 0x992   :  { %987 = vrot.lane.b32.xlu1 %v983_v61, %s2132_s21  ;;  %v999_v5 = vunpack.c.l.b16 %v983_v61 }
 0x994   :  { %v2441_v7 = vpack.c.b16 %v999_v5, %v999_v5 }
 0x997   :  { %v980_v63 = vpop.f32.mrf.mxu0 }
 0x998   :  { %v984_v1 = vpack.c.bf16 %v980_v63, %v980_v63 }
 0x99a   :  { %991 = vrot.lane.b32.xlu1 %v983_v61, %s2133_s22  ;;  %993 = vrot.lane.b32.xlu2 %v984_v1, %s2133_s22  ;;  %v1022_v6 = vunpack.c.l.b16 %v984_v1 }
 0x99b   :  { %989 = vrot.lane.b32.xlu0 %v984_v1, %s2132_s21 }
 0x99c   :  { %v2443_v8 = vpack.c.b16 %v1022_v6, %v1022_v6 }
 0x9a2   :  { %997 = vrot.lane.b32.xlu2 %v984_v1, %s2131_s20 }
 0x9a3   :  { %995 = vrot.lane.b32.xlu0 %v983_v61, %s2131_s20 }
 0x9aa   :  { %1001 = vrot.lane.b32.xlu2 %v2441_v7, %s2134_s23 }
 0x9ab   :  { %1024 = vrot.lane.b32.xlu0 %v2443_v8, %s2134_s23 }
 0x9f4   :  { %v994_v9 = vpop.permute.xlu2 %993 }
 0x9f5   :  { %v1114_v17 = vunpack.c.l.b16 %v994_v9 }
 0x9f7   :  { %v2455_v3 = vpack.c.b16 %v1114_v17, %v1114_v17 }
 0x9fc   :  { %v998_v0 = vpop.permute.xlu2 %997 }
 0x9fd   :  { %v1160_v25 = vunpack.c.l.b16 %v998_v0 }
 0x9ff   :  { %v2463_v16 = vpack.c.b16 %v1160_v25, %v1160_v25 }
 0xa04   :  { %v988_v12 = vpop.permute.xlu1 %987  ;;  %v1002_v13 = vpop.permute.xlu2 %1001 }
 0xa05   :  { %v1045_v14 = vunpack.c.l.b16 %v988_v12  ;;  %v1007_v2 = vsel %vm207_vm8, %v1002_v13, 0 }
 0xa06   :  { %1016 = vmatpush.bf16.xpose.msrb.mxu1 %v1007_v2 }
 0xa07   :  { %v2450_v15 = vpack.c.b16 %v1045_v14, %v1045_v14 }
 0xa09   :  { %1047 = vrot.lane.b32.xlu1 %v2450_v15, %s2134_s23 }
 0xa0c   :  { %v992_v24 = vpop.permute.xlu1 %991 }
 0xa0d   :  { %v990_v19 = vpop.permute.xlu0 %989  ;;  %1784 = vmatmul.msk.bf16.vlgmr.msrb.gmra.mxu1 %vm207_vm8, %v983_v61  ;;  %v1091_v26 = vunpack.c.l.b16 %v992_v24 }
 0xa0e   :  { %v1068_v21 = vunpack.c.l.b16 %v990_v19 }
 0xa0f   :  { %v2465_v29 = vpack.c.b16 %v1091_v26, %v1091_v26 }
 0xa10   :  { %v2457_v23 = vpack.c.b16 %v1068_v21, %v1068_v21 }
 0xa11   :  { %1116 = vrot.lane.b32.xlu1 %v2455_v3, %s2134_s23 }
 0xa12   :  { %1070 = vrot.lane.b32.xlu0 %v2457_v23, %s2134_s23 }
 0xa15   :  { %v996_v62 = vpop.permute.xlu0 %995 }
 0xa16   :  { %v1137_v28 = vunpack.c.l.b16 %v996_v62 }
 0xa18   :  { %v2467_v30 = vpack.c.b16 %v1137_v28, %v1137_v28 }
 0xa19   :  { %1162 = vrot.lane.b32.xlu1 %v2463_v16, %s2134_s23 }
 0xa1a   :  { %1139 = vrot.lane.b32.xlu2 %v2467_v30, %s2134_s23  ;;  %1093 = vrot.lane.b32.xlu0 %v2465_v29, %s2134_s23 }
 0xa1d   :  { %v1025_v4 = vpop.permute.xlu0 %1024 }
 0xa1e   :  { %v1030_v31 = vsel %vm207_vm8, %v1025_v4, 0 }
 0xa1f   :  { %1039 = vmatpush.bf16.xpose.msrb.mxu2 %v1030_v31 }
 0xa26   :  { %1785 = vmatmul.msk.bf16.vlgmr.msrb.gmra.mxu2 %vm207_vm8, %v984_v1 }
 0xa74   :  { %v1140_v32 = vpop.permute.xlu2 %1139 }
 0xa75   :  { %v1145_v35 = vsel %vm207_vm8, %v1140_v32, 0 }
 0xa7b   :  { %v1048_v33 = vpop.permute.xlu1 %1047 }
 0xa7c   :  { %v1053_v34 = vsel %vm207_vm8, %v1048_v33, 0 }
 0xa7d   :  { %1062 = vmatpush.bf16.xpose.msrb.mxu3 %v1053_v34 }
 0xa83   :  { %v1117_v36 = vpop.permute.xlu1 %1116 }
 0xa84   :  { %v1122_v37 = vsel %vm207_vm8, %v1117_v36, 0  ;;  %v1071_v38 = vpop.permute.xlu0 %1070  ;;  %1786 = vmatmul.msk.bf16.vlgmr.msrb.gmra.mxu3 %vm207_vm8, %v988_v12 }
 0xa85   :  { %1154 = vmatpush.bf16.xpose.msra.mxu3 %v1145_v35  ;;  %v1076_v39 = vsel %vm207_vm8, %v1071_v38, 0  ;;  %1131 = vmatpush.bf16.xpose.msra.mxu2 %v1122_v37 }
 0xa86   :  { %1085 = vmatpush.bf16.xpose.msra.mxu0 %v1076_v39 }
 0xa8a   :  { %v1018_v40 = vpop.f32.mrf.mxu1 }
 0xa8b   :  { %v1163_v27 = vpop.permute.xlu1 %1162  ;;  %v1183_v41 = vsel %vm207_vm8, %v1018_v40, -inf }
 0xa8c   :  { %v1168_v42 = vsel %vm207_vm8, %v1163_v27, 0  ;;  %v1094_v43 = vpop.permute.xlu0 %1093  ;;  %1184 = vmax.xlane.f32.xlu1 %v1183_v41  ;;  %1789 = vmatmul.msk.bf16.vlgmr.msra.gmra.mxu2 %vm207_vm8, %v994_v9 }
 0xa8d   :  { %v1099_v44 = vsel %vm207_vm8, %v1094_v43, 0  ;;  %1787 = vmatmul.msk.bf16.vlgmr.msra.gmra.mxu0 %vm207_vm8, %v990_v19 }
 0xa8e   :  { %1108 = vmatpush.bf16.xpose.msra.mxu1 %v1099_v44  ;;  %1177 = vmatpush.bf16.xpose.msrb.mxu0 %v1168_v42 }
 0xa92   :  { %v1020_v45 = vpop.f32.mrf.mxu1 }
 0xa94   :  { %1790 = vmatmul.msk.bf16.vlgmr.msra.gmra.mxu3 %vm207_vm8, %v996_v62 }
 0xa95   :  { %1788 = vmatmul.msk.bf16.vlgmr.msra.gmra.mxu1 %vm207_vm8, %v992_v24 }
 0xa9d   :  { %1791 = vmatmul.msk.bf16.vlgmr.msrb.gmra.mxu0 %vm207_vm8, %v998_v0 }
 0xaa5   :  { %1279 = vrot.lane.b32.xlu1 %v2441_v7, %s2135_s24 }
 0xaa9   :  { %v1041_v46 = vpop.f32.mrf.mxu2 }
 0xaaa   :  { %v1186_v47 = vsel %vm207_vm8, %v1041_v46, -inf }
 0xaab   :  { %1187 = vmax.xlane.f32.xlu2 %v1186_v47 }
 0xab1   :  { %v1043_v48 = vpop.f32.mrf.mxu2 }
 0xaff   :  { %v1185_v52 = vpop.xlane.xlu1 %1184 }
 0xb00   :  { %v1207_v14 = vsub.f32 %v1018_v40, %v1185_v52 }
 0xb02   :  { %v1215_v2 = vmul.f32 1.442695, %v1207_v14 }
 0xb07   :  { %v1064_v49 = vpop.f32.mrf.mxu3 }
 0xb08   :  { %v1189_v50 = vsel %vm207_vm8, %v1064_v49, -inf }
 0xb09   :  { %1190 = vmax.xlane.f32.xlu0 %v1189_v50 }
 0xb0a   :  { %v1087_v51 = vpop.f32.mrf.mxu0 }
 0xb0b   :  { %v1192_v1 = vsel %vm207_vm8, %v1087_v51, -inf }
 0xb0f   :  { %v1066_v53 = vpop.f32.mrf.mxu3  ;;  %v2494_v54 = vpop.f32.mrf.mxu2 }
 0xb12   :  { %v1089_v20 = vpop.f32.mrf.mxu0  ;;  %v1110_v55 = vpop.f32.mrf.mxu1 }
 0xb13   :  { %v1195_v11 = vsel %vm207_vm8, %v1110_v55, -inf }
 0xb14   :  { %1196 = vmax.xlane.f32.xlu2 %v1195_v11 }
 0xb17   :  { %v1280_v56 = vpop.permute.xlu1 %1279  ;;  %v1135_v57 = vpop.f32.mrf.mxu2 }
 0xb18   :  { %v1285_v58 = vsel %vm489_vm9, %v1280_v56, 0  ;;  %v1156_v59 = vpop.f32.mrf.mxu3 }
 0xb19   :  { %v1201_v60 = vsel %vm207_vm8, %v1156_v59, -inf  ;;  %1294 = vmatpush.bf16.msrb.mxu1 %v1285_v58 }
 0xb1a   :  { %1202 = vmax.xlane.f32.xlu1 %v1201_v60  ;;  %v1112_v61 = vpop.f32.mrf.mxu1  ;;  %v2499_v63 = vpop.f32.mrf.mxu0 }
 0xb1b   :  { %v1204_v21 = vsel %vm207_vm8, %v2499_v63, -inf }
 0xb1c   :  { %1193 = vmax.xlane.f32.xlu2 %v1192_v1 }
 0xb1d   :  { %1321 = vrot.lane.b32.xlu0 %v2450_v15, %s2135_s24  ;;  %v1198_v15 = vsel %vm207_vm8, %v2494_v54, -inf }
 0xb1e   :  { %v1188_v5 = vpop.xlane.xlu2 %1187 }
 0xb1f   :  { %v1208_v6 = vsub.f32 %v1041_v46, %v1188_v5 }
 0xb20   :  { %v1158_v7 = vpop.f32.mrf.mxu3 }
 0xb21   :  { %v1217_v9 = vmul.f32 1.442695, %v1208_v6 }
 0xb22   :  { %v1181_v0 = vpop.f32.mrf.mxu0 }
 0xb23   :  { %1981 = vpow2.f32 %v1217_v9 }
 0xb24   :  { %1983 = vpow2.f32 %v1215_v2 }
 0xb29   :  { %v1982_v12 = vpop.eup %1981 }
 0xb2a   :  { %v1234_v13 = vsel %vm207_vm8, %v1982_v12, 0.0  ;;  %v1984_v17 = vpop.eup %1983 }
 0xb2b   :  { %1235 = vadd.xlane.f32.xlu1 %v1234_v13  ;;  %v1231_v19 = vsel %vm207_vm8, %v1984_v17, 0.0 }
 0xb34   :  { %1300 = vrot.lane.b32.xlu2 %v2443_v8, %s2135_s24 }
 0xb47   :  { %1232 = vadd.xlane.f32.xlu0 %v1231_v19 }
 0xb4f   :  { %1199 = vmax.xlane.f32.xlu0 %v1198_v15 }
 0xb57   :  { %1205 = vmax.xlane.f32.xlu0 %v1204_v21 }
 0xb6b   :  { %1342 = vrot.lane.b32.xlu0 %v2457_v23, %s2135_s24 }
 0xb7c   :  { %v1191_v24 = vpop.xlane.xlu0 %1190 }
 0xb7d   :  { %v1209_v8 = vsub.f32 %v1064_v49, %v1191_v24 }
 0xb7f   :  { %v1219_v25 = vmul.f32 1.442695, %v1209_v8 }
 0xb81   :  { %1985 = vpow2.f32 %v1219_v25 }
 0xb87   :  { %v2514_v26 = vpop.eup %1985  ;;  %v1197_v62 = vpop.xlane.xlu2 %1196 }
 0xb88   :  { %v1211_v28 = vsub.f32 %v1110_v55, %v1197_v62  ;;  %v1237_v4 = vsel %vm207_vm8, %v2514_v26, 0.0 }
 0xb89   :  { %1238 = vadd.xlane.f32.xlu2 %v1237_v4 }
 0xb8a   :  { %v1223_v31 = vmul.f32 1.442695, %v1211_v28 }
 0xb8c   :  { %1987 = vpow2.f32 %v1223_v31 }
 0xb8d   :  { %v1203_v32 = vpop.xlane.xlu1 %1202 }
 0xb8e   :  { %v1213_v33 = vsub.f32 %v1156_v59, %v1203_v32 }
 0xb8f   :  { %v1194_v34 = vpop.xlane.xlu2 %1193  ;;  %v1322_v35 = vpop.permute.xlu0 %1321 }
 0xb90   :  { %v1227_v36 = vmul.f32 1.442695, %v1213_v33  ;;  %v1210_v23 = vsub.f32 %v1087_v51, %v1194_v34  ;;  %v1327_v37 = vsel %vm489_vm9, %v1322_v35, 0 }
 0xb91   :  { %1336 = vmatpush.bf16.msrb.mxu3 %v1327_v37 }
 0xb92   :  { %v2519_v38 = vpop.eup %1987  ;;  %1989 = vpow2.f32 %v1227_v36  ;;  %v1221_v39 = vmul.f32 1.442695, %v1210_v23 }
 0xb93   :  { %v1243_v40 = vsel %vm207_vm8, %v2519_v38, 0.0 }
 0xb94   :  { %1991 = vpow2.f32 %v1221_v39  ;;  %1244 = vadd.xlane.f32.xlu1 %v1243_v40 }
 0xb97   :  { %v1301_v27 = vpop.permute.xlu2 %1300 }
 0xb98   :  { %v1990_v41 = vpop.eup %1989  ;;  %v1306_v42 = vsel %vm489_vm9, %v1301_v27, 0 }
 0xb99   :  { %1315 = vmatpush.bf16.msrb.mxu2 %v1306_v42  ;;  %v1249_v43 = vsel %vm207_vm8, %v1990_v41, 0.0 }
 0xb9a   :  { %v1992_v44 = vpop.eup %1991  ;;  %1250 = vadd.xlane.f32.xlu0 %v1249_v43 }
 0xb9b   :  { %v1240_v45 = vsel %vm207_vm8, %v1992_v44, 0.0 }
 0xb9c   :  { %1241 = vadd.xlane.f32.xlu1 %v1240_v45 }
 0xb9e   :  { %v1236_v46 = vpop.xlane.xlu1 %1235 }
 0xb9f   :  { %1993 = vrcp.f32 %v1236_v46 }
 0xba5   :  { %v1994_v47 = vpop.eup %1993 }
 0xba6   :  { %v1264_v48 = vmul.f32 %v1994_v47, %v1982_v12 }
 0xba8   :  { %v1272_v49 = vpack.c.bf16 %v1264_v48, %v1264_v48 }
 0xbaa   :  { %1793 = vmatmul.msk.bf16.vlgmr.msrb.gmra.mxu2 %vm207_vm8, %v1272_v49 }
 0xbae   :  { %1405 = vrot.lane.b32.xlu0 %v2467_v30, %s2135_s24 }
 0xbb5   :  { %1363 = vrot.lane.b32.xlu1 %v2465_v29, %s2135_s24 }
 0xbb6   :  { %1426 = vrot.lane.b32.xlu0 %v2463_v16, %s2135_s24 }
 0xbba   :  { %v1233_v50 = vpop.xlane.xlu0 %1232 }
 0xbbb   :  { %1995 = vrcp.f32 %v1233_v50 }
 0xbc1   :  { %v1996_v51 = vpop.eup %1995 }
 0xbc2   :  { %v1263_v52 = vmul.f32 %v1996_v51, %v1984_v17  ;;  %v1200_v53 = vpop.xlane.xlu0 %1199 }
 0xbc3   :  { %v1212_v20 = vsub.f32 %v2494_v54, %v1200_v53 }
 0xbc4   :  { %v1271_v55 = vpack.c.bf16 %v1263_v52, %v1263_v52 }
 0xbc5   :  { %v1225_v11 = vmul.f32 1.442695, %v1212_v20 }
 0xbc6   :  { %1792 = vmatmul.msk.bf16.vlgmr.msrb.gmra.mxu1 %vm207_vm8, %v1271_v55 }
 0xbc7   :  { %1997 = vpow2.f32 %v1225_v11  ;;  %v1867_v11 = vld [vmem:[%s2628_s2 + $0x18] sm:$0xff] }
 0xbca   :  { %v1206_v56 = vpop.xlane.xlu0 %1205 }
 0xbcb   :  { %v1214_v30 = vsub.f32 %v2499_v63, %v1206_v56  ;;  %v1866_v56 = vld [vmem:[%s2628_s2 + $0x10] sm:$0xff] }
 0xbcd   :  { %v1998_v57 = vpop.eup %1997  ;;  %v1229_v29 = vmul.f32 1.442695, %v1214_v30 }
 0xbce   :  { %v1246_v58 = vsel %vm207_vm8, %v1998_v57, 0.0 }
 0xbcf   :  { %1999 = vpow2.f32 %v1229_v29  ;;  %1247 = vadd.xlane.f32.xlu2 %v1246_v58 }
 0xbd5   :  { %v2000_v16 = vpop.eup %1999 }
 0xbd6   :  { %v1252_v59 = vsel %vm207_vm8, %v2000_v16, 0.0 }
 0xbd7   :  { %1253 = vadd.xlane.f32.xlu2 %v1252_v59 }
 0xbdd   :  { %v1343_v60 = vpop.permute.xlu0 %1342 }
 0xbde   :  { %v1348_v54 = vsel %vm489_vm9, %v1343_v60, 0 }
 0xbdf   :  { %1357 = vmatpush.bf16.msra.mxu0 %v1348_v54 }
 0xbef   :  { %1384 = vrot.lane.b32.xlu2 %v2455_v3, %s2135_s24 }
 0xbfc   :  { %v1239_v61 = vpop.xlane.xlu2 %1238 }
 0xbfd   :  { %2001 = vrcp.f32 %v1239_v61 }
 0xc03   :  { %v2002_v63 = vpop.eup %2001 }
 0xc04   :  { %v1265_v1 = vmul.f32 %v2002_v63, %v2514_v26 }
 0xc06   :  { %v1273_v5 = vpack.c.bf16 %v1265_v1, %v1265_v1 }
 0xc07   :  { %v1245_v6 = vpop.xlane.xlu1 %1244 }
 0xc08   :  { %1794 = vmatmul.msk.bf16.vlgmr.msrb.gmra.mxu3 %vm207_vm8, %v1273_v5 }
 0xc0d   :  { %v1251_v9 = vpop.xlane.xlu0 %1250 }
 0xc0f   :  { %v1242_v7 = vpop.xlane.xlu1 %1241 }
 0xc10   :  { %2003 = vrcp.f32 %v1242_v7 }
 0xc11   :  { %2005 = vrcp.f32 %v1251_v9 }
 0xc12   :  { %2007 = vrcp.f32 %v1245_v6 }
 0xc16   :  { %v2004_v0 = vpop.eup %2003 }
 0xc17   :  { %v1266_v12 = vmul.f32 %v2004_v0, %v1992_v44  ;;  %v2006_v14 = vpop.eup %2005 }
 0xc18   :  { %v1269_v3 = vmul.f32 %v2006_v14, %v1990_v41  ;;  %v2008_v19 = vpop.eup %2007 }
 0xc19   :  { %v1274_v13 = vpack.c.bf16 %v1266_v12, %v1266_v12  ;;  %v1267_v21 = vmul.f32 %v2008_v19, %v2519_v38 }
 0xc1a   :  { %v1277_v15 = vpack.c.bf16 %v1269_v3, %v1269_v3 }
 0xc1b   :  { %1795 = vmatmul.msk.bf16.vlgmr.msra.gmra.mxu0 %vm207_vm8, %v1274_v13  ;;  %v1275_v62 = vpack.c.bf16 %v1267_v21, %v1267_v21 }
 0xc20   :  { %v1406_v2 = vpop.permute.xlu0 %1405 }
 0xc21   :  { %v1411_v17 = vsel %vm489_vm9, %v1406_v2, 0 }
 0xc22   :  { %1420 = vmatpush.bf16.msra.mxu3 %v1411_v17 }
 0xc25   :  { %1798 = vmatmul.msk.bf16.vlgmr.msra.gmra.mxu3 %vm207_vm8, %v1277_v15 }
 0xc27   :  { %v1364_v24 = vpop.permute.xlu1 %1363 }
 0xc28   :  { %v1369_v8 = vsel %vm489_vm9, %v1364_v24, 0  ;;  %v1427_v25 = vpop.permute.xlu0 %1426 }
 0xc29   :  { %v1432_v26 = vsel %vm489_vm9, %v1427_v25, 0  ;;  %1378 = vmatpush.bf16.msra.mxu1 %v1369_v8 }
 0xc2a   :  { %1441 = vmatpush.bf16.msrb.mxu0 %v1432_v26 }
 0xc2c   :  { %1796 = vmatmul.msk.bf16.vlgmr.msra.gmra.mxu1 %vm207_vm8, %v1275_v62 }
 0xc2d   :  { %v1317_v28 = vpop.f32.mrf.mxu2  ;;  %1504 = vmatpush.bf16.msrb.mxu1 %v1867_v11 }
 0xc31   :  { %1505 = vmatpush.bf16.msrb.mxu1 %v1866_v56  ;;  %v1873_v56 = vld [vmem:[%s2633_s7 + $0x38] sm:$0xff] }
 0xc32   :  { %1676 = vmatpush.bf16.msrb.mxu3 %v1873_v56 }
 0xc35   :  { %v1319_v4 = vpop.f32.mrf.mxu2 }
 0xc42   :  { %v1248_v31 = vpop.xlane.xlu2 %1247 }
 0xc43   :  { %v1296_v32 = vpop.f32.mrf.mxu1  ;;  %2009 = vrcp.f32 %v1248_v31 }
 0xc49   :  { %v2010_v35 = vpop.eup %2009 }
 0xc4a   :  { %v1254_v33 = vpop.xlane.xlu2 %1253  ;;  %v1268_v23 = vmul.f32 %v2010_v35, %v1998_v57 }
 0xc4b   :  { %2011 = vrcp.f32 %v1254_v33  ;;  %v1298_v34 = vpop.f32.mrf.mxu1  ;;  %v1868_v33 = vld [vmem:[%s2631_s5 + $0x10] sm:$0xff] }
 0xc4c   :  { %v1276_v27 = vpack.c.bf16 %v1268_v23, %v1268_v23 }
 0xc51   :  { %v2012_v36 = vpop.eup %2011 }
 0xc52   :  { %v1270_v37 = vmul.f32 %v2012_v36, %v2000_v16  ;;  %v1385_v38 = vpop.permute.xlu2 %1384 }
 0xc53   :  { %v1390_v39 = vsel %vm489_vm9, %v1385_v38, 0 }
 0xc54   :  { %v1278_v40 = vpack.c.bf16 %v1270_v37, %v1270_v37  ;;  %1399 = vmatpush.bf16.msra.mxu2 %v1390_v39 }
 0xc56   :  { %1799 = vmatmul.msk.bf16.vlgmr.msrb.gmra.mxu0 %vm207_vm8, %v1278_v40 }
 0xc57   :  { %1797 = vmatmul.msk.bf16.vlgmr.msra.gmra.mxu2 %vm207_vm8, %v1276_v27 }
 0xc8b   :  { %v1338_v41 = vpop.f32.mrf.mxu3 }
 0xc93   :  { %v1340_v42 = vpop.f32.mrf.mxu3 }
 0xc98   :  { %v1359_v43 = vpop.f32.mrf.mxu0 }
 0xc99   :  { %v1904_v44 = vpack.i.bf16 %v1359_v43, %v1338_v41 }
 0xc9b   :  { %1905 = vrot.lane.b32.xlu2 %v1904_v44, %s2128_s3 }
 0xca0   :  { %v1361_v45 = vpop.f32.mrf.mxu0 }
 0xca8   :  { %v1422_v46 = vpop.f32.mrf.mxu3 }
 0xca9   :  { %v1380_v47 = vpop.f32.mrf.mxu1 }
 0xcb0   :  { %v1424_v48 = vpop.f32.mrf.mxu3 }
 0xcb1   :  { %v1382_v49 = vpop.f32.mrf.mxu1 }
 0xcd3   :  { %v1443_v50 = vpop.f32.mrf.mxu0 }
 0xcd4   :  { %v1914_v51 = vpack.i.bf16 %v1443_v50, %v1422_v46  ;;  %v1928_v50 = vld [vmem:[%s2636_s10 + $0x1] ss:$0 sm:$0xff] }
 0xcd6   :  { %1915 = vrot.lane.b32.xlu0 %v1914_v51, %s2136_s26 }
 0xcda   :  { %v1401_v52 = vpop.f32.mrf.mxu2 }
 0xcdb   :  { %v1909_v53 = vpack.i.bf16 %v1401_v52, %v1380_v47  ;;  %v1445_v20 = vpop.f32.mrf.mxu0  ;;  %v1927_v47 = vld [vmem:[#allocation7 + $0x1] ss:$0 sm:$0xff] }
 0xcdd   :  { %1910 = vrot.lane.b32.xlu1 %v1909_v53, %s2124_s25 }
 0xce2   :  { %v1403_v55 = vpop.f32.mrf.mxu2 }
 0xcf5   :  { %v1906_v30 = vpop.permute.xlu2 %1905 }
 0xcf6   :  { %v1908_v57 = vunpack.i.h.bf16 %v1906_v30  ;;  %v1907_v29 = vunpack.i.l.bf16 %v1906_v30  ;;  %v1872_v30 = vld [vmem:[%s2633_s7 + $0x30] sm:$0xff] }
 0xcf7   :  { %1677 = vmatpush.bf16.msrb.mxu3 %v1872_v30 }
 0xcf8   :  { %v1472_v54 = vsel %vm207_vm8, %v1317_v28, %v1908_v57  ;;  %v1471_v61 = vsel %vm207_vm8, %v1296_v32, %v1907_v29  ;;  %v1869_v28 = vld [vmem:[%s2631_s5 + $0x18] sm:$0xff]  ;;  %v1871_v57 = vld [vmem:[%s2633_s7 + $0x28] sm:$0xff]  ;;  %v1929_v29 = vld [vmem:[%s2632_s6 + $0x1] ss:$0 sm:$0xff] }
 0xcf9   :  { %1604 = vmatpush.bf16.msrb.mxu2 %v1869_v28 }
 0xcfb   :  { %1678 = vmatpush.bf16.msrb.mxu3 %v1871_v57 }
 0xcfd   :  { %1605 = vmatpush.bf16.msrb.mxu2 %v1868_v33 }
 0xd48   :  { %v1916_v58 = vpop.permute.xlu0 %1915 }
 0xd49   :  { %v1918_v63 = vunpack.i.h.bf16 %v1916_v58  ;;  %v1917_v1 = vunpack.i.l.bf16 %v1916_v58 }
 0xd4f   :  { %v1911_v16 = vpop.permute.xlu1 %1910 }
 0xd50   :  { %v1913_v59 = vunpack.i.h.bf16 %v1911_v16  ;;  %v1912_v60 = vunpack.i.l.bf16 %v1911_v16  ;;  %v1870_v16 = vld [vmem:[%s2633_s7 + $0x20] sm:$0xff] }
 0xd51   :  { %1679 = vmatpush.bf16.msrb.mxu3 %v1870_v16 }
 0xd52   :  { %v1473_v5 = vsel %vm679_vm10, %v1471_v61, %v1912_v60  ;;  %v1474_v6 = vsel %vm679_vm10, %v1472_v54, %v1913_v59 }
 0xd53   :  { %v1475_v7 = vsel %vm682_vm11, %v1473_v5, %v1917_v1  ;;  %v1476_v9 = vsel %vm682_vm11, %v1474_v6, %v1918_v63 }
 0xd54   :  { %v1477_v0 = vpack.c.bf16 %v1476_v9, %v1475_v7 }
 0xd56   :  { %1812 = vmatmul.msk.bf16.vlgmr.msrb.gmra.mxu1 %vm91_vm0, %v1477_v0 }
 0xdd3   :  { %v1507_v12 = vpop.f32.mrf.mxu1 }
 0xdd4   :  { %v2570_v13 = vadd.f32 %v1507_v12, %v2408_v18 }
 0xdd6   :  { %v1518_v14 = vsel %vm91_vm0, %v2570_v13, 0.0 }
 0xdd7   :  { %1519 = vadd.xlane.f32.xlu2 %v1518_v14 }
 0xddb   :  { %v1509_v3 = vpop.f32.mrf.mxu1 }
 0xddc   :  { %v2575_v2 = vadd.f32 %v1509_v3, %v2413_v22 }
 0xdde   :  { %v1521_v17 = vsel %vm91_vm0, %v2575_v2, 0.0 }
 0xddf   :  { %1522 = vadd.xlane.f32.xlu1 %v1521_v17 }
 0xe4a   :  { %v1520_v19 = vpop.xlane.xlu2 %1519 }
 0xe4b   :  { %v1524_v15 = vmul.f32 %v1520_v19, %v2222_v10 }
 0xe4d   :  { %v1526_v21 = vsub.f32 %v2570_v13, %v1524_v15 }
 0xe4f   :  { %v1528_v24 = vmul.f32 %v1526_v21, %v1526_v21 }
 0xe51   :  { %v1530_v18 = vsel %vm91_vm0, %v1528_v24, 0.0 }
 0xe52   :  { %1531 = vadd.xlane.f32.xlu0 %v1530_v18  ;;  %v1523_v8 = vpop.xlane.xlu1 %1522 }
 0xe53   :  { %v1525_v25 = vmul.f32 %v1523_v8, %v2222_v10 }
 0xe55   :  { %v1527_v26 = vsub.f32 %v2575_v2, %v1525_v25 }
 0xe57   :  { %v1529_v22 = vmul.f32 %v1527_v26, %v1527_v26 }
 0xe59   :  { %v1533_v62 = vsel %vm91_vm0, %v1529_v22, 0.0 }
 0xe5a   :  { %1534 = vadd.xlane.f32.xlu2 %v1533_v62 }
 0xec5   :  { %v1532_v4 = vpop.xlane.xlu0 %1531 }
 0xec6   :  { %v1536_v31 = vmul.f32 %v1532_v4, %v2222_v10 }
 0xec8   :  { %v1538_v32 = vadd.f32 1e-05, %v1536_v31 }
 0xeca   :  { %2013 = vrsqrt.f32 %v1538_v32  ;;  %vm1546_vm9 = vweird.f32 %v1538_v32 }
 0xecd   :  { %v1535_v34 = vpop.xlane.xlu2 %1534 }
 0xece   :  { %v1537_v35 = vmul.f32 %v1535_v34, %v2222_v10 }
 0xed0   :  { %v2014_v36 = vpop.eup %2013  ;;  %v1539_v23 = vadd.f32 1e-05, %v1537_v35 }
 0xed1   :  { %v1541_v37 = vmul.f32 %v2014_v36, %v1538_v32  ;;  %vm1547_vm8 = vweird.f32 %v2014_v36 }
 0xed2   :  { %2015 = vrsqrt.f32 %v1539_v23  ;;  %vm1548_vm10 = vmor %vm1546_vm9, %vm1547_vm8  ;;  %vm1556_vm14 = vweird.f32 %v1539_v23 }
 0xed3   :  { %v1542_v38 = vmul.f32 %v2014_v36, %v1541_v37 }
 0xed5   :  { %v1543_v39 = vmul.f32 0.5, %v1542_v38 }
 0xed7   :  { %v1544_v40 = vsub.f32 1.5, %v1543_v39 }
 0xed8   :  { %v2016_v27 = vpop.eup %2015 }
 0xed9   :  { %v1545_v41 = vmul.f32 %v2014_v36, %v1544_v40  ;;  %v1551_v42 = vmul.f32 %v2016_v27, %v1539_v23  ;;  %vm1557_vm11 = vweird.f32 %v2016_v27 }
 0xeda   :  { %vm1558_vm15 = vmor %vm1556_vm14, %vm1557_vm11 }
 0xedb   :  { %v1552_v43 = vmul.f32 %v2016_v27, %v1551_v42  ;;  %v1549_v44 = vsel %vm1548_vm10, %v2014_v36, %v1545_v41 }
 0xedc   :  { %v1560_v10 = vmul.f32 %v1549_v44, %v1526_v21 }
 0xedd   :  { %v1553_v45 = vmul.f32 0.5, %v1552_v43 }
 0xede   :  { %v1565_v51 = vmul.f32 %v1927_v47, %v1560_v10 }
 0xedf   :  { %v1554_v46 = vsub.f32 1.5, %v1553_v45 }
 0xee0   :  { %v1570_v20 = vadd.f32 %v1928_v50, %v1565_v51 }
 0xee1   :  { %v1555_v48 = vmul.f32 %v2016_v27, %v1554_v46 }
 0xee3   :  { %v1559_v49 = vsel %vm1558_vm15, %v2016_v27, %v1555_v48 }
 0xee4   :  { %v1561_v52 = vmul.f32 %v1559_v49, %v1527_v26  ;;  %v1930_v26 = vld [vmem:[%s2634_s8 + $0x1] ss:$0 sm:$0xff] }
 0xee6   :  { %v1566_v53 = vmul.f32 %v1927_v47, %v1561_v52 }
 0xee8   :  { %v1571_v55 = vadd.f32 %v1928_v50, %v1566_v53 }
 0xeea   :  { %v1572_v11 = vpack.c.bf16 %v1571_v55, %v1570_v20 }
 0xeec   :  { %1827 = vmatmul.msk.bf16.vlgmr.msrb.gmra.mxu2 %vm91_vm0, %v1572_v11 }
 0xf6f   :  { %v1607_v58 = vpop.f32.mrf.mxu2 }
 0xf70   :  { %v1608_v59 = vadd.f32 %v1929_v29, %v1607_v58 }
 0xf72   :  { %v1612_v60 = vmul.f32 %v1608_v59, %v1608_v59 }
 0xf74   :  { %v1614_v54 = vmul.f32 %v1612_v60, %v1608_v59 }
 0xf76   :  { %v1616_v61 = vmul.f32 0.044715, %v1614_v54 }
 0xf77   :  { %v1609_v63 = vpop.f32.mrf.mxu2 }
 0xf78   :  { %v1618_v1 = vadd.f32 %v1616_v61, %v1608_v59  ;;  %v1610_v5 = vadd.f32 %v1929_v29, %v1609_v63 }
 0xf7a   :  { %v1620_v6 = vmul.f32 0.7978846, %v1618_v1  ;;  %v1613_v7 = vmul.f32 %v1610_v5, %v1610_v5 }
 0xf7c   :  { %v1615_v9 = vmul.f32 %v1613_v7, %v1610_v5  ;;  %2017 = vtanh.f32 %v1620_v6 }
 0xf7e   :  { %v1617_v0 = vmul.f32 0.044715, %v1615_v9 }
 0xf80   :  { %v1619_v12 = vadd.f32 %v1617_v0, %v1610_v5 }
 0xf82   :  { %v1621_v14 = vmul.f32 0.7978846, %v1619_v12  ;;  %v2018_v3 = vpop.eup %2017 }
 0xf83   :  { %v1624_v17 = vadd.f32 1.0, %v2018_v3 }
 0xf84   :  { %2019 = vtanh.f32 %v1621_v14 }
 0xf85   :  { %v1626_v15 = vmul.f32 0.5, %v1624_v17 }
 0xf87   :  { %v1628_v18 = vmul.f32 %v1626_v15, %v1608_v59 }
 0xf8a   :  { %v2020_v19 = vpop.eup %2019 }
 0xf8b   :  { %v1625_v21 = vadd.f32 1.0, %v2020_v19 }
 0xf8d   :  { %v1627_v24 = vmul.f32 0.5, %v1625_v21 }
 0xf8f   :  { %v1629_v8 = vmul.f32 %v1627_v24, %v1610_v5 }
 0xf91   :  { %v1630_v25 = vpack.c.bf16 %v1629_v8, %v1628_v18 }
 0xf93   :  { %1853 = vmatmul.msk.bf16.vlgmr.msrb.gmra.mxu3 %vm870_vm3, %v1630_v25 }
0x1016   :  { %v1681_v22 = vpop.f32.mrf.mxu3 }
0x1017   :  { %v1682_v62 = vadd.f32 %v1930_v26, %v1681_v22 }
0x1019   :  { %v1686_v28 = vadd.f32 %v1682_v62, %v2570_v13 }
0x101b   :  { %1688 = vst.msk [vmem:[#allocation8] sm:$0xff] %vm91_vm0, %v1686_v28 }
0x101e   :  { %v1683_v4 = vpop.f32.mrf.mxu3 }
0x101f   :  { %v1684_v31 = vadd.f32 %v1930_v26, %v1683_v4 }
0x1021   :  { %v1687_v32 = vadd.f32 %v1684_v31, %v2575_v2 }
0x1023   :  { %1689 = vst.msk [vmem:[#allocation8 + $0x8] sm:$0xff] %vm91_vm0, %v1687_v32 }
0x1024   :  { %1702 = dma.vmem_to_hbm [thread:$0]  %s1695_s18, 256, %s1697_s27, [#allocation4], %s2127_s29, %s2127_s29, %s2128_s3  }
0x1025   :  { %2121 = dma.done.wait [#allocation4], 256  }
0x1026   :  { %2122 = vsyncadd [#allocation4], 4294967040 }
0x1027   :  { %1707 = vsyncpa [#allocation3], 1 }
0x1028   :  { %1708 = vsyncpa [#allocation6], 1 }
0x1029   :  { %1709 = vsyncpa [#allocation4], 1 }

</bundles_post_ra>
